<compile_context>
chip_gen: v5e
topology: v5e:2x2
jax: 0.10.0
libtpu: 0.0.40
codegen_flags: <defaults>
</compile_context>

<pallas_src>
import functools

import jax
import jax.numpy as jnp
from jax.experimental import pallas as pl
from jax.experimental.pallas import tpu as pltpu


# ----------------------------------------------------------------------------
# Pallas kernels
# ----------------------------------------------------------------------------
def _conv1x1_prelu_kernel(x_ref, w_ref, b_ref, a_ref, o_ref):
    """o[:, :, tile] = PReLU(w @ x[:, :, tile] + b).

    x: [1, Cin, TN]   w: [Cout, Cin]   b, a: [Cout, 1]   o: [1, Cout, TN]
    Slope a == 1 gives an identity activation (used for self.down).
    Pixels live in the lane dimension -> dense (unmasked) stores.
    """
    y = jnp.dot(w_ref[...], x_ref[0], preferred_element_type=jnp.float32)
    y = y + b_ref[...]
    a = a_ref[...]
    o_ref[0] = jnp.where(y >= 0.0, y, a * y).astype(o_ref.dtype)


def _csa_attention_kernel(rn_ref, q_ref, v_ref, o_ref, m_sc, l_sc, acc_sc,
                          *, softmax_scale, l_valid, tl, mask_l):
    """Flash-style cross-scale attention, transposed layout.

    rn : [1, TL, Kq]  L2-normalized 3x3 ref patches (bf16)
    q  : [1, Kq, TQ]  3x3 query patches of conv_match_1(x), pixels in lanes (bf16)
    v  : [1, Kr, TL]  6x6 raw patches of conv_assembly(x) (bf16)
    o  : [1, Kr, TQ]  = raw_w @ softmax_L(scale * rn @ q)      (f32)

    Online softmax over the L (reference patch) grid axis; m/l/acc persist in
    VMEM scratch across that axis.
    """
    li = pl.program_id(2)

    @pl.when(li == 0)
    def _init():
        m_sc[...] = jnp.full(m_sc.shape, -jnp.inf, m_sc.dtype)
        l_sc[...] = jnp.zeros(l_sc.shape, l_sc.dtype)
        acc_sc[...] = jnp.zeros(acc_sc.shape, acc_sc.dtype)

    rn = rn_ref[0]                      # [TL, Kq] bf16
    q = q_ref[0]                        # [Kq, TQ] bf16
    v = v_ref[0]                        # [Kr, TL] bf16

    # correlation scores for this (query tile, ref tile) pair
    s = jnp.dot(rn, q, preferred_element_type=jnp.float32) * softmax_scale
    if mask_l:                          # zero-padded reference patches -> -inf
        rows = jax.lax.broadcasted_iota(jnp.int32, s.shape, 0) + li * tl
        s = jnp.where(rows < l_valid, s, -jnp.inf)

    m_prev = m_sc[...]                                        # [1, TQ]
    m_new = jnp.maximum(m_prev, jnp.max(s, axis=0, keepdims=True))
    alpha = jnp.exp(m_prev - m_new)                           # [1, TQ]
    p = jnp.exp(s - m_new)                                    # [TL, TQ]
    l_sc[...] = alpha * l_sc[...] + jnp.sum(p, axis=0, keepdims=True)
    acc_sc[...] = alpha * acc_sc[...] + jnp.dot(
        v, p.astype(v.dtype), preferred_element_type=jnp.float32)  # [Kr, TQ]
    m_sc[...] = m_new

    @pl.when(li == pl.num_programs(2) - 1)
    def _finalize():
        inv_l = pl.reciprocal(l_sc[...], approx=True)         # EUP slot
        o_ref[0] = (acc_sc[...] * inv_l).astype(o_ref.dtype)


# ----------------------------------------------------------------------------
# pallas_call wrappers
# ----------------------------------------------------------------------------
def _conv1x1_prelu(x3, w, b, a, *, tn=2048):
    """x3: [B, Cin, N] -> [B, Cout, N], tiled over the pixel (lane) axis."""
    B, Cin, N = x3.shape
    Cout = w.shape[0]
    TN = tn if N > tn else N
    grid = (B, pl.cdiv(N, TN))
    return pl.pallas_call(
        _conv1x1_prelu_kernel,
        out_shape=jax.ShapeDtypeStruct((B, Cout, N), jnp.float32),
        grid=grid,
        in_specs=[
            pl.BlockSpec((1, Cin, TN), lambda bb, i: (bb, 0, i)),
            pl.BlockSpec((Cout, Cin), lambda bb, i: (0, 0)),
            pl.BlockSpec((Cout, 1), lambda bb, i: (0, 0)),
            pl.BlockSpec((Cout, 1), lambda bb, i: (0, 0)),
        ],
        out_specs=pl.BlockSpec((1, Cout, TN), lambda bb, i: (bb, 0, i)),
        compiler_params=pltpu.CompilerParams(
            dimension_semantics=("parallel", "parallel")),
    )(x3, w, b, a)


def _csa_attention(rn, q_t, v_t, softmax_scale):
    """rn:[B,L,Kq] f32, q_t:[B,Kq,N] f32, v_t:[B,Kr,L] f32 -> [B,Kr,N] f32."""
    B, L, Kq = rn.shape
    Kr = v_t.shape[1]
    N = q_t.shape[2]

    TQ = 512 if N > 512 else N          # query-pixel tile
    TL = 512 if L > 512 else L          # reference-patch tile
    nq = pl.cdiv(N, TQ)
    nl = pl.cdiv(L, TL)
    Np = nq * TQ
    Lp = nl * TL

    qb = q_t.astype(jnp.bfloat16)
    rb = rn.astype(jnp.bfloat16)
    vb = v_t.astype(jnp.bfloat16)
    if Np != N:
        qb = jnp.pad(qb, ((0, 0), (0, 0), (0, Np - N)))
    if Lp != L:
        rb = jnp.pad(rb, ((0, 0), (0, Lp - L), (0, 0)))
        vb = jnp.pad(vb, ((0, 0), (0, 0), (0, Lp - L)))

    kern = functools.partial(
        _csa_attention_kernel, softmax_scale=float(softmax_scale),
        l_valid=L, tl=TL, mask_l=(Lp != L))

    out = pl.pallas_call(
        kern,
        out_shape=jax.ShapeDtypeStruct((B, Kr, Np), jnp.float32),
        grid=(B, nq, nl),
        in_specs=[
            pl.BlockSpec((1, TL, Kq), lambda b, qi, li: (b, li, 0)),
            pl.BlockSpec((1, Kq, TQ), lambda b, qi, li: (b, 0, qi)),
            pl.BlockSpec((1, Kr, TL), lambda b, qi, li: (b, 0, li)),
        ],
        out_specs=pl.BlockSpec((1, Kr, TQ), lambda b, qi, li: (b, 0, qi)),
        scratch_shapes=[
            pltpu.VMEM((1, TQ), jnp.float32),     # running max
            pltpu.VMEM((1, TQ), jnp.float32),     # running sum
            pltpu.VMEM((Kr, TQ), jnp.float32),    # accumulator
        ],
        compiler_params=pltpu.CompilerParams(
            dimension_semantics=("parallel", "parallel", "arbitrary"),
            vmem_limit_bytes=48 * 1024 * 1024),
    )(rb, qb, vb)
    return out[:, :, :N] if Np != N else out


# ----------------------------------------------------------------------------
# JAX glue
# ----------------------------------------------------------------------------
def _extract_patches_cf(x, ksize, stride, pad):
    """x: [B, C, H, W] -> [B, C*k*k, oh*ow]; feature order (c, kh, kw) matches
    torch.nn.Unfold (channels-first)."""
    B, C, H, W = x.shape
    xp = jnp.pad(x, ((0, 0), (0, 0), (pad, pad), (pad, pad)))
    oh = (H + 2 * pad - ksize) // stride + 1
    ow = (W + 2 * pad - ksize) // stride + 1
    cols = []
    for kh in range(ksize):
        for kw in range(ksize):
            cols.append(xp[:, :, kh:kh + stride * (oh - 1) + 1:stride,
                           kw:kw + stride * (ow - 1) + 1:stride])
    pat = jnp.stack(cols, axis=2)                     # [B, C, k*k, oh, ow]
    return pat.reshape(B, C * ksize * ksize, oh * ow), oh, ow


def _fold_stride2(out_t, B, C, Hp, Wp, s, ksize):
    """Overlap-add fold of [B, C*(s*k)^2, Hp*Wp] aggregated patches with
    stride s, i.e. F.conv_transpose2d(..., stride=s, padding=s), for s == 2.

    Parity-decomposed: 4 output phases, 9 shifted adds each -> reads the
    patch tensor exactly once instead of 36 strided RMW canvas passes."""
    k2 = s * ksize                                                   # 6
    P = out_t.reshape(B, C, k2 // s, s, k2 // s, s, Hp, Wp)          # (a,p,b,q)
    Ppad = jnp.pad(P, ((0, 0), (0, 0), (0, 0), (0, 0),
                       (0, 0), (0, 0), (1, 1), (1, 1)))
    acc = jnp.zeros((B, C, s, s, Hp, Wp), jnp.float32)
    for a in range(k2 // s):
        for b in range(k2 // s):
            acc = acc + Ppad[:, :, a, :, b, :,
                             2 - a:2 - a + Hp, 2 - b:2 - b + Wp]
    # acc[b, c, p, q, u, v] -> y_up[b, c, s*u + p, s*v + q]
    y_up = jnp.transpose(acc, (0, 1, 4, 2, 5, 3)).reshape(B, C, s * Hp, s * Wp)
    return y_up


def cross_scale_attention_forward(x_nchw, params, *, ksize=3, scale=2, stride=1,
                                  softmax_scale=10.0):
    assert scale == 2 and stride == 1, \
        "only the default scale=2, stride=1 configuration is implemented"
    B, C, H, W = x_nchw.shape
    s = scale
    Cr = params["w_m2"].shape[0]

    mod_pad_h = (s - H % s) % s
    mod_pad_w = (s - W % s) % s
    x = x_nchw
    if mod_pad_h or mod_pad_w:
        x = jnp.pad(x, ((0, 0), (0, 0), (0, mod_pad_h), (0, mod_pad_w)),
                    mode="reflect")
    Hp, Wp = H + mod_pad_h, W + mod_pad_w
    N = Hp * Wp

    # --- fused conv_assembly + conv_match_1 (1x1 conv + PReLU) -----------------
    x3 = x.reshape(B, C, N)
    fused = _conv1x1_prelu(x3, params["wa_m1"], params["ba_m1"], params["aa_m1"])
    embed_w = fused[:, :C, :].reshape(B, C, Hp, Wp)           # conv_assembly
    match_x = fused[:, C:, :].reshape(B, Cr, Hp, Wp)          # conv_match_1

    # --- bilinear x0.5 downsample (align_corners=False) == 2x2 mean -----------
    Hl, Wl = Hp // s, Wp // s
    ref_in = x.reshape(B, C, Hl, s, Wl, s).mean(axis=(3, 5))
    ref = _conv1x1_prelu(ref_in.reshape(B, C, Hl * Wl),
                         params["w_m2"], params["b_m2"], params["a_m2"])
    ref = ref.reshape(B, Cr, Hl, Wl)

    # --- im2col ('same' padding is symmetric for these configurations) --------
    q_cf, _, _ = _extract_patches_cf(match_x, ksize, stride, ksize // 2)     # [B, Kq, N]
    w_cf, _, _ = _extract_patches_cf(ref, ksize, stride, ksize // 2)         # [B, Kq, L]
    v_cf, _, _ = _extract_patches_cf(embed_w, s * ksize, s * stride,
                                     (s * ksize - s * stride) // 2)          # [B, Kr, L]

    # L2-normalize reference patches once (f32), escape_NaN clamp, transpose.
    norm = jnp.maximum(jnp.sqrt(jnp.sum(w_cf * w_cf, axis=1, keepdims=True)),
                       1e-4)
    rn = jnp.transpose(w_cf / norm, (0, 2, 1))                               # [B, L, Kq]

    # --- fused correlation + softmax + aggregation (flash-style) --------------
    out_t = _csa_attention(rn, q_cf, v_cf, softmax_scale)                    # [B, Kr, N]

    # --- overlap-add fold == F.conv_transpose2d(stride=s, padding=s) ----------
    y_up = _fold_stride2(out_t, B, C, Hp, Wp, s, ksize)                      # [B, C, 2Hp, 2Wp]

    # --- self.down: 3x3 stride-2 conv via im2col + matmul kernel (no act) -----
    d_cf, dh, dw = _extract_patches_cf(y_up, ksize, 2, 1)                    # [B, C*9, Hp*Wp]
    y = _conv1x1_prelu(d_cf, params["w_down"], params["b_down"],
                       jnp.ones((C, 1), jnp.float32))                        # slope 1 == identity
    # matches PyTorch: yi = self.down(yi); yi = yi / 6.0  (divide AFTER bias)
    y = (y / 6.0).reshape(B, C, dh, dw)
    return y[:, :, :H, :W]                                                   # NCHW


# ----------------------------------------------------------------------------
# Deterministic parameter init (shapes from the PyTorch __init__)
# ----------------------------------------------------------------------------
def init_params(key, channel=8, reduction=2, ksize=3):
    Cr = channel // reduction
    ks = jax.random.split(key, 8)

    def wn(k, shape, scale=0.1):
        return jax.random.normal(k, shape, dtype=jnp.float32) * scale

    # PyTorch conv weights [Cout, Cin, kh, kw]; 1x1 convs squeeze to [Cout, Cin].
    w_ca = wn(ks[0], (channel, channel))          # conv_assembly
    b_ca = wn(ks[1], (channel, 1))
    w_m1 = wn(ks[2], (Cr, channel))               # conv_match_1
    b_m1 = wn(ks[3], (Cr, 1))
    w_m2 = wn(ks[4], (Cr, channel))               # conv_match_2
    b_m2 = wn(ks[5], (Cr, 1))
    w_down = wn(ks[6], (channel, channel, ksize, ksize)).reshape(
        channel, channel * ksize * ksize)         # [Co, Ci*kh*kw]
    b_down = wn(ks[7], (channel, 1))

    a = 0.25                                      # nn.PReLU() init
    wa_m1 = jnp.concatenate([w_ca, w_m1], axis=0)             # fused [C+Cr, C]
    ba_m1 = jnp.concatenate([b_ca, b_m1], axis=0)
    aa_m1 = jnp.concatenate([jnp.full((channel, 1), a, jnp.float32),
                             jnp.full((Cr, 1), a, jnp.float32)], axis=0)
    a_m2 = jnp.full((Cr, 1), a, jnp.float32)
    return dict(wa_m1=wa_m1, ba_m1=ba_m1, aa_m1=aa_m1,
                w_m2=w_m2, b_m2=b_m2, a_m2=a_m2,
                w_down=w_down, b_down=b_down)


if __name__ == "__main__":
    key = jax.random.PRNGKey(0)
    kp, kx = jax.random.split(key)

    B, C, H, W = 2, 8, 16, 16          # small shapes; channel % reduction == 0
    params = init_params(kp, channel=C, reduction=2, ksize=3)
    x = jax.random.normal(kx, (B, C, H, W), dtype=jnp.float32)

    fwd = jax.jit(cross_scale_attention_forward)
    y = jax.block_until_ready(fwd(x, params))

    assert y.shape == (B, C, H, W), y.shape
    assert y.dtype == jnp.float32
    assert bool(jnp.all(jnp.isfinite(y)))
    print("KERNEL_OK")
</pallas_src>

<mosaic_0001>
module attributes {stable_mosaic.version = 11 : i64} {
  func.func @_conv1x1_prelu_kernel(%arg0: i32, %arg1: i32, %arg2: memref<1x8x256xf32, #tpu.memory_space<vmem>>, %arg3: memref<12x8xf32, #tpu.memory_space<vmem>>, %arg4: memref<12x1xf32, #tpu.memory_space<vmem>>, %arg5: memref<12x1xf32, #tpu.memory_space<vmem>>, %arg6: memref<1x12x256xf32, #tpu.memory_space<vmem>>) attributes {dimension_semantics = [#tpu.dimension_semantics<parallel>, #tpu.dimension_semantics<parallel>], iteration_bounds = array<i64: 2, 1>, scalar_prefetch = 0 : i64, scratch_operands = 0 : i64, tpu.core_type = #tpu.core_type<tc>, window_params = [{transform_indices = @transform_0, window_bounds = array<i64: 1, 8, 256>}, {pipeline_mode = #tpu.pipeline_mode<synchronous>, transform_indices = @transform_1, window_bounds = array<i64: 12, 8>}, {pipeline_mode = #tpu.pipeline_mode<synchronous>, transform_indices = @transform_2, window_bounds = array<i64: 12, 1>}, {pipeline_mode = #tpu.pipeline_mode<synchronous>, transform_indices = @transform_3, window_bounds = array<i64: 12, 1>}, {transform_indices = @transform_4, window_bounds = array<i64: 1, 12, 256>}]} {
    %c0 = arith.constant 0 : index
    %c0_0 = arith.constant 0 : index
    %0 = vector.load %arg3[%c0, %c0_0] : memref<12x8xf32, #tpu.memory_space<vmem>>, vector<12x8xf32>
    %c0_1 = arith.constant 0 : index
    %c0_2 = arith.constant 0 : index
    %c0_3 = arith.constant 0 : index
    %1 = vector.load %arg2[%c0_1, %c0_2, %c0_3] : memref<1x8x256xf32, #tpu.memory_space<vmem>>, vector<1x8x256xf32>
    %2 = vector.shape_cast %1 : vector<1x8x256xf32> to vector<8x256xf32>
    %cst = arith.constant dense<0.000000e+00> : vector<12x256xf32>
    %3 = tpu.matmul %0, %2, %cst {dimension_numbers = #tpu.dot_dimension_numbers<[1], [0], [0], [1], [0, 0, 1, 1], [], []>} : vector<12x8xf32>, vector<8x256xf32>, vector<12x256xf32> -> vector<12x256xf32>
    %c0_4 = arith.constant 0 : index
    %c0_5 = arith.constant 0 : index
    %4 = vector.load %arg4[%c0_4, %c0_5] : memref<12x1xf32, #tpu.memory_space<vmem>>, vector<12x1xf32>
    %5 = vector.broadcast %4 : vector<12x1xf32> to vector<12x256xf32>
    %6 = arith.addf %3, %5 : vector<12x256xf32>
    %c0_6 = arith.constant 0 : index
    %c0_7 = arith.constant 0 : index
    %7 = vector.load %arg5[%c0_6, %c0_7] : memref<12x1xf32, #tpu.memory_space<vmem>>, vector<12x1xf32>
    %cst_8 = arith.constant 0.000000e+00 : f32
    %8 = vector.broadcast %cst_8 : f32 to vector<12x256xf32>
    %9 = arith.cmpf oge, %6, %8 : vector<12x256xf32>
    %10 = vector.broadcast %7 : vector<12x1xf32> to vector<12x256xf32>
    %11 = arith.mulf %10, %6 : vector<12x256xf32>
    %12 = arith.select %9, %6, %11 : vector<12x256xi1>, vector<12x256xf32>
    %c0_9 = arith.constant 0 : index
    %c0_10 = arith.constant 0 : index
    %c0_11 = arith.constant 0 : index
    %13 = vector.load %arg6[%c0_9, %c0_10, %c0_11] : memref<1x12x256xf32, #tpu.memory_space<vmem>>, vector<1x12x256xf32>
    %14 = vector.shape_cast %13 : vector<1x12x256xf32> to vector<12x256xf32>
    %15 = vector.shape_cast %12 : vector<12x256xf32> to vector<1x12x256xf32>
    tpu.vector_store %arg6[%c0_9, %c0_10, %c0_11], %15 {strides = array<i32>} : memref<1x12x256xf32, #tpu.memory_space<vmem>>, vector<1x12x256xf32>,
    return
  }
  func.func @transform_0(%arg0: i32, %arg1: i32) -> (i32, i32, i32) {
    %c0_i32 = arith.constant 0 : i32
    %c0_i32_0 = arith.constant 0 : i32
    return %arg0, %c0_i32, %arg1 : i32, i32, i32
  }
  func.func @transform_1(%arg0: i32, %arg1: i32) -> (i32, i32) {
    %c0_i32 = arith.constant 0 : i32
    %c0_i32_0 = arith.constant 0 : i32
    %c0_i32_1 = arith.constant 0 : i32
    return %c0_i32, %c0_i32_0 : i32, i32
  }
  func.func @transform_2(%arg0: i32, %arg1: i32) -> (i32, i32) {
    %c0_i32 = arith.constant 0 : i32
    %c0_i32_0 = arith.constant 0 : i32
    %c0_i32_1 = arith.constant 0 : i32
    return %c0_i32, %c0_i32_0 : i32, i32
  }
  func.func @transform_3(%arg0: i32, %arg1: i32) -> (i32, i32) {
    %c0_i32 = arith.constant 0 : i32
    %c0_i32_0 = arith.constant 0 : i32
    %c0_i32_1 = arith.constant 0 : i32
    return %c0_i32, %c0_i32_0 : i32, i32
  }
  func.func @transform_4(%arg0: i32, %arg1: i32) -> (i32, i32, i32) {
    %c0_i32 = arith.constant 0 : i32
    %c0_i32_0 = arith.constant 0 : i32
    return %arg0, %c0_i32, %arg1 : i32, i32, i32
  }
}

module attributes {stable_mosaic.version = 11 : i64} {
  func.func @_conv1x1_prelu_kernel(%arg0: i32, %arg1: i32, %arg2: memref<1x8x64xf32, #tpu.memory_space<vmem>>, %arg3: memref<4x8xf32, #tpu.memory_space<vmem>>, %arg4: memref<4x1xf32, #tpu.memory_space<vmem>>, %arg5: memref<4x1xf32, #tpu.memory_space<vmem>>, %arg6: memref<1x4x64xf32, #tpu.memory_space<vmem>>) attributes {dimension_semantics = [#tpu.dimension_semantics<parallel>, #tpu.dimension_semantics<parallel>], iteration_bounds = array<i64: 2, 1>, scalar_prefetch = 0 : i64, scratch_operands = 0 : i64, tpu.core_type = #tpu.core_type<tc>, window_params = [{transform_indices = @transform_0, window_bounds = array<i64: 1, 8, 64>}, {pipeline_mode = #tpu.pipeline_mode<synchronous>, transform_indices = @transform_1, window_bounds = array<i64: 4, 8>}, {pipeline_mode = #tpu.pipeline_mode<synchronous>, transform_indices = @transform_2, window_bounds = array<i64: 4, 1>}, {pipeline_mode = #tpu.pipeline_mode<synchronous>, transform_indices = @transform_3, window_bounds = array<i64: 4, 1>}, {transform_indices = @transform_4, window_bounds = array<i64: 1, 4, 64>}]} {
    %c0 = arith.constant 0 : index
    %c0_0 = arith.constant 0 : index
    %0 = vector.load %arg3[%c0, %c0_0] : memref<4x8xf32, #tpu.memory_space<vmem>>, vector<4x8xf32>
    %c0_1 = arith.constant 0 : index
    %c0_2 = arith.constant 0 : index
    %c0_3 = arith.constant 0 : index
    %1 = vector.load %arg2[%c0_1, %c0_2, %c0_3] : memref<1x8x64xf32, #tpu.memory_space<vmem>>, vector<1x8x64xf32>
    %2 = vector.shape_cast %1 : vector<1x8x64xf32> to vector<8x64xf32>
    %cst = arith.constant dense<0.000000e+00> : vector<4x64xf32>
    %3 = tpu.matmul %0, %2, %cst {dimension_numbers = #tpu.dot_dimension_numbers<[1], [0], [0], [1], [0, 0, 1, 1], [], []>} : vector<4x8xf32>, vector<8x64xf32>, vector<4x64xf32> -> vector<4x64xf32>
    %c0_4 = arith.constant 0 : index
    %c0_5 = arith.constant 0 : index
    %4 = vector.load %arg4[%c0_4, %c0_5] : memref<4x1xf32, #tpu.memory_space<vmem>>, vector<4x1xf32>
    %5 = vector.broadcast %4 : vector<4x1xf32> to vector<4x64xf32>
    %6 = arith.addf %3, %5 : vector<4x64xf32>
    %c0_6 = arith.constant 0 : index
    %c0_7 = arith.constant 0 : index
    %7 = vector.load %arg5[%c0_6, %c0_7] : memref<4x1xf32, #tpu.memory_space<vmem>>, vector<4x1xf32>
    %cst_8 = arith.constant 0.000000e+00 : f32
    %8 = vector.broadcast %cst_8 : f32 to vector<4x64xf32>
    %9 = arith.cmpf oge, %6, %8 : vector<4x64xf32>
    %10 = vector.broadcast %7 : vector<4x1xf32> to vector<4x64xf32>
    %11 = arith.mulf %10, %6 : vector<4x64xf32>
    %12 = arith.select %9, %6, %11 : vector<4x64xi1>, vector<4x64xf32>
    %c0_9 = arith.constant 0 : index
    %c0_10 = arith.constant 0 : index
    %c0_11 = arith.constant 0 : index
    %13 = vector.load %arg6[%c0_9, %c0_10, %c0_11] : memref<1x4x64xf32, #tpu.memory_space<vmem>>, vector<1x4x64xf32>
    %14 = vector.shape_cast %13 : vector<1x4x64xf32> to vector<4x64xf32>
    %15 = vector.shape_cast %12 : vector<4x64xf32> to vector<1x4x64xf32>
    tpu.vector_store %arg6[%c0_9, %c0_10, %c0_11], %15 {strides = array<i32>} : memref<1x4x64xf32, #tpu.memory_space<vmem>>, vector<1x4x64xf32>,
    return
  }
  func.func @transform_0(%arg0: i32, %arg1: i32) -> (i32, i32, i32) {
    %c0_i32 = arith.constant 0 : i32
    %c0_i32_0 = arith.constant 0 : i32
    return %arg0, %c0_i32, %arg1 : i32, i32, i32
  }
  func.func @transform_1(%arg0: i32, %arg1: i32) -> (i32, i32) {
    %c0_i32 = arith.constant 0 : i32
    %c0_i32_0 = arith.constant 0 : i32
    %c0_i32_1 = arith.constant 0 : i32
    return %c0_i32, %c0_i32_0 : i32, i32
  }
  func.func @transform_2(%arg0: i32, %arg1: i32) -> (i32, i32) {
    %c0_i32 = arith.constant 0 : i32
    %c0_i32_0 = arith.constant 0 : i32
    %c0_i32_1 = arith.constant 0 : i32
    return %c0_i32, %c0_i32_0 : i32, i32
  }
  func.func @transform_3(%arg0: i32, %arg1: i32) -> (i32, i32) {
    %c0_i32 = arith.constant 0 : i32
    %c0_i32_0 = arith.constant 0 : i32
    %c0_i32_1 = arith.constant 0 : i32
    return %c0_i32, %c0_i32_0 : i32, i32
  }
  func.func @transform_4(%arg0: i32, %arg1: i32) -> (i32, i32, i32) {
    %c0_i32 = arith.constant 0 : i32
    %c0_i32_0 = arith.constant 0 : i32
    return %arg0, %c0_i32, %arg1 : i32, i32, i32
  }
}

module attributes {stable_mosaic.version = 11 : i64} {
  func.func @_csa_attention_kernel(%arg0: i32, %arg1: i32, %arg2: i32, %arg3: memref<1x64x36xbf16, #tpu.memory_space<vmem>>, %arg4: memref<1x36x256xbf16, #tpu.memory_space<vmem>>, %arg5: memref<1x288x64xbf16, #tpu.memory_space<vmem>>, %arg6: memref<1x288x256xf32, #tpu.memory_space<vmem>>, %arg7: memref<1x256xf32, #tpu.memory_space<vmem>>, %arg8: memref<1x256xf32, #tpu.memory_space<vmem>>, %arg9: memref<288x256xf32, #tpu.memory_space<vmem>>) attributes {dimension_semantics = [#tpu.dimension_semantics<parallel>, #tpu.dimension_semantics<parallel>, #tpu.dimension_semantics<arbitrary>], iteration_bounds = array<i64: 2, 1, 1>, scalar_prefetch = 0 : i64, scratch_operands = 3 : i64, tpu.core_type = #tpu.core_type<tc>, window_params = [{transform_indices = @transform_0, window_bounds = array<i64: 1, 64, 36>}, {transform_indices = @transform_1, window_bounds = array<i64: 1, 36, 256>}, {transform_indices = @transform_2, window_bounds = array<i64: 1, 288, 64>}, {transform_indices = @transform_3, window_bounds = array<i64: 1, 288, 256>}]} {
    %c0_i32 = arith.constant 0 : i32
    %0 = arith.cmpi eq, %arg2, %c0_i32 : i32
    %1 = arith.extui %0 : i1 to i32
    %c0_i32_0 = arith.constant 0 : i32
    %2 = arith.cmpi ne, %1, %c0_i32_0 : i32
    scf.if %2 {
      %cst_27 = arith.constant 0xFF800000 : f32
      %38 = vector.broadcast %cst_27 : f32 to vector<1x256xf32>
      %c0_28 = arith.constant 0 : index
      %c0_29 = arith.constant 0 : index
      %39 = vector.load %arg7[%c0_28, %c0_29] : memref<1x256xf32, #tpu.memory_space<vmem>>, vector<1x256xf32>
      tpu.vector_store %arg7[%c0_28, %c0_29], %38 {strides = array<i32>} : memref<1x256xf32, #tpu.memory_space<vmem>>, vector<1x256xf32>,
      %cst_30 = arith.constant 0.000000e+00 : f32
      %40 = vector.broadcast %cst_30 : f32 to vector<1x256xf32>
      %c0_31 = arith.constant 0 : index
      %c0_32 = arith.constant 0 : index
      %41 = vector.load %arg8[%c0_31, %c0_32] : memref<1x256xf32, #tpu.memory_space<vmem>>, vector<1x256xf32>
      tpu.vector_store %arg8[%c0_31, %c0_32], %40 {strides = array<i32>} : memref<1x256xf32, #tpu.memory_space<vmem>>, vector<1x256xf32>,
      %cst_33 = arith.constant 0.000000e+00 : f32
      %42 = vector.broadcast %cst_33 : f32 to vector<288x256xf32>
      %c0_34 = arith.constant 0 : index
      %c0_35 = arith.constant 0 : index
      %43 = vector.load %arg9[%c0_34, %c0_35] : memref<288x256xf32, #tpu.memory_space<vmem>>, vector<288x256xf32>
      tpu.vector_store %arg9[%c0_34, %c0_35], %42 {strides = array<i32>} : memref<288x256xf32, #tpu.memory_space<vmem>>, vector<288x256xf32>,
    } else {
    }
    %c0 = arith.constant 0 : index
    %c0_1 = arith.constant 0 : index
    %c0_2 = arith.constant 0 : index
    %3 = vector.load %arg3[%c0, %c0_1, %c0_2] : memref<1x64x36xbf16, #tpu.memory_space<vmem>>, vector<1x64x36xbf16>
    %4 = vector.shape_cast %3 : vector<1x64x36xbf16> to vector<64x36xbf16>
    %c0_3 = arith.constant 0 : index
    %c0_4 = arith.constant 0 : index
    %c0_5 = arith.constant 0 : index
    %5 = vector.load %arg4[%c0_3, %c0_4, %c0_5] : memref<1x36x256xbf16, #tpu.memory_space<vmem>>, vector<1x36x256xbf16>
    %6 = vector.shape_cast %5 : vector<1x36x256xbf16> to vector<36x256xbf16>
    %c0_6 = arith.constant 0 : index
    %c0_7 = arith.constant 0 : index
    %c0_8 = arith.constant 0 : index
    %7 = vector.load %arg5[%c0_6, %c0_7, %c0_8] : memref<1x288x64xbf16, #tpu.memory_space<vmem>>, vector<1x288x64xbf16>
    %8 = vector.shape_cast %7 : vector<1x288x64xbf16> to vector<288x64xbf16>
    %cst = arith.constant dense<0.000000e+00> : vector<64x256xf32>
    %9 = tpu.matmul %4, %6, %cst {dimension_numbers = #tpu.dot_dimension_numbers<[1], [0], [0], [1], [0, 0, 1, 1], [], []>} : vector<64x36xbf16>, vector<36x256xbf16>, vector<64x256xf32> -> vector<64x256xf32>
    %cst_9 = arith.constant 1.000000e+01 : f32
    %10 = vector.broadcast %cst_9 : f32 to vector<64x256xf32>
    %11 = arith.mulf %9, %10 : vector<64x256xf32>
    %c0_10 = arith.constant 0 : index
    %c0_11 = arith.constant 0 : index
    %12 = vector.load %arg7[%c0_10, %c0_11] : memref<1x256xf32, #tpu.memory_space<vmem>>, vector<1x256xf32>
    %cst_12 = arith.constant dense<0xFF800000> : vector<256xf32>
    %13 = vector.multi_reduction <maximumf>, %11, %cst_12 [0] : vector<64x256xf32> to vector<256xf32>
    %14 = vector.shape_cast %13 : vector<256xf32> to vector<1x256xf32>
    %15 = arith.maximumf %12, %14 : vector<1x256xf32>
    %16 = arith.subf %12, %15 : vector<1x256xf32>
    %17 = math.exp %16 : vector<1x256xf32>
    %18 = vector.broadcast %15 : vector<1x256xf32> to vector<64x256xf32>
    %19 = arith.subf %11, %18 : vector<64x256xf32>
    %20 = math.exp %19 : vector<64x256xf32>
    %c0_13 = arith.constant 0 : index
    %c0_14 = arith.constant 0 : index
    %21 = vector.load %arg8[%c0_13, %c0_14] : memref<1x256xf32, #tpu.memory_space<vmem>>, vector<1x256xf32>
    %22 = arith.mulf %17, %21 : vector<1x256xf32>
    %cst_15 = arith.constant dense<0.000000e+00> : vector<256xf32>
    %23 = vector.multi_reduction <add>, %20, %cst_15 [0] : vector<64x256xf32> to vector<256xf32>
    %24 = vector.shape_cast %23 : vector<256xf32> to vector<1x256xf32>
    %25 = arith.addf %22, %24 : vector<1x256xf32>
    %c0_16 = arith.constant 0 : index
    %c0_17 = arith.constant 0 : index
    %26 = vector.load %arg8[%c0_16, %c0_17] : memref<1x256xf32, #tpu.memory_space<vmem>>, vector<1x256xf32>
    tpu.vector_store %arg8[%c0_16, %c0_17], %25 {strides = array<i32>} : memref<1x256xf32, #tpu.memory_space<vmem>>, vector<1x256xf32>,
    %c0_18 = arith.constant 0 : index
    %c0_19 = arith.constant 0 : index
    %27 = vector.load %arg9[%c0_18, %c0_19] : memref<288x256xf32, #tpu.memory_space<vmem>>, vector<288x256xf32>
    %28 = vector.broadcast %17 : vector<1x256xf32> to vector<288x256xf32>
    %29 = arith.mulf %28, %27 : vector<288x256xf32>
    %30 = arith.truncf %20 : vector<64x256xf32> to vector<64x256xbf16>
    %cst_20 = arith.constant dense<0.000000e+00> : vector<288x256xf32>
    %31 = tpu.matmul %8, %30, %cst_20 {dimension_numbers = #tpu.dot_dimension_numbers<[1], [0], [0], [1], [0, 0, 1, 1], [], []>} : vector<288x64xbf16>, vector<64x256xbf16>, vector<288x256xf32> -> vector<288x256xf32>
    %32 = arith.addf %29, %31 : vector<288x256xf32>
    %c0_21 = arith.constant 0 : index
    %c0_22 = arith.constant 0 : index
    %33 = vector.load %arg9[%c0_21, %c0_22] : memref<288x256xf32, #tpu.memory_space<vmem>>, vector<288x256xf32>
    tpu.vector_store %arg9[%c0_21, %c0_22], %32 {strides = array<i32>} : memref<288x256xf32, #tpu.memory_space<vmem>>, vector<288x256xf32>,
    %c0_23 = arith.constant 0 : index
    %c0_24 = arith.constant 0 : index
    %34 = vector.load %arg7[%c0_23, %c0_24] : memref<1x256xf32, #tpu.memory_space<vmem>>, vector<1x256xf32>
    tpu.vector_store %arg7[%c0_23, %c0_24], %15 {strides = array<i32>} : memref<1x256xf32, #tpu.memory_space<vmem>>, vector<1x256xf32>,
    %c0_i32_25 = arith.constant 0 : i32
    %35 = arith.cmpi eq, %arg2, %c0_i32_25 : i32
    %36 = arith.extui %35 : i1 to i32
    %c0_i32_26 = arith.constant 0 : i32
    %37 = arith.cmpi ne, %36, %c0_i32_26 : i32
    scf.if %37 {
      %c0_27 = arith.constant 0 : index
      %c0_28 = arith.constant 0 : index
      %38 = vector.load %arg8[%c0_27, %c0_28] : memref<1x256xf32, #tpu.memory_space<vmem>>, vector<1x256xf32>
      %39 = tpu.reciprocal %38 {approx = true} : vector<1x256xf32> -> vector<1x256xf32>
      %c0_29 = arith.constant 0 : index
      %c0_30 = arith.constant 0 : index
      %40 = vector.load %arg9[%c0_29, %c0_30] : memref<288x256xf32, #tpu.memory_space<vmem>>, vector<288x256xf32>
      %41 = vector.broadcast %39 : vector<1x256xf32> to vector<288x256xf32>
      %42 = arith.mulf %40, %41 : vector<288x256xf32>
      %c0_31 = arith.constant 0 : index
      %c0_32 = arith.constant 0 : index
      %c0_33 = arith.constant 0 : index
      %43 = vector.load %arg6[%c0_31, %c0_32, %c0_33] : memref<1x288x256xf32, #tpu.memory_space<vmem>>, vector<1x288x256xf32>
      %44 = vector.shape_cast %43 : vector<1x288x256xf32> to vector<288x256xf32>
      %45 = vector.shape_cast %42 : vector<288x256xf32> to vector<1x288x256xf32>
      tpu.vector_store %arg6[%c0_31, %c0_32, %c0_33], %45 {strides = array<i32>} : memref<1x288x256xf32, #tpu.memory_space<vmem>>, vector<1x288x256xf32>,
    } else {
    }
    return
  }
  func.func @transform_0(%arg0: i32, %arg1: i32, %arg2: i32) -> (i32, i32, i32) {
    %c0_i32 = arith.constant 0 : i32
    %c0_i32_0 = arith.constant 0 : i32
    return %arg0, %arg2, %c0_i32 : i32, i32, i32
  }
  func.func @transform_1(%arg0: i32, %arg1: i32, %arg2: i32) -> (i32, i32, i32) {
    %c0_i32 = arith.constant 0 : i32
    %c0_i32_0 = arith.constant 0 : i32
    return %arg0, %c0_i32, %arg1 : i32, i32, i32
  }
  func.func @transform_2(%arg0: i32, %arg1: i32, %arg2: i32) -> (i32, i32, i32) {
    %c0_i32 = arith.constant 0 : i32
    %c0_i32_0 = arith.constant 0 : i32
    return %arg0, %c0_i32, %arg2 : i32, i32, i32
  }
  func.func @transform_3(%arg0: i32, %arg1: i32, %arg2: i32) -> (i32, i32, i32) {
    %c0_i32 = arith.constant 0 : i32
    %c0_i32_0 = arith.constant 0 : i32
    return %arg0, %c0_i32, %arg1 : i32, i32, i32
  }
}

module attributes {stable_mosaic.version = 11 : i64} {
  func.func @_conv1x1_prelu_kernel(%arg0: i32, %arg1: i32, %arg2: memref<1x72x256xf32, #tpu.memory_space<vmem>>, %arg3: memref<8x72xf32, #tpu.memory_space<vmem>>, %arg4: memref<8x1xf32, #tpu.memory_space<vmem>>, %arg5: memref<8x1xf32, #tpu.memory_space<vmem>>, %arg6: memref<1x8x256xf32, #tpu.memory_space<vmem>>) attributes {dimension_semantics = [#tpu.dimension_semantics<parallel>, #tpu.dimension_semantics<parallel>], iteration_bounds = array<i64: 2, 1>, scalar_prefetch = 0 : i64, scratch_operands = 0 : i64, tpu.core_type = #tpu.core_type<tc>, window_params = [{transform_indices = @transform_0, window_bounds = array<i64: 1, 72, 256>}, {pipeline_mode = #tpu.pipeline_mode<synchronous>, transform_indices = @transform_1, window_bounds = array<i64: 8, 72>}, {pipeline_mode = #tpu.pipeline_mode<synchronous>, transform_indices = @transform_2, window_bounds = array<i64: 8, 1>}, {pipeline_mode = #tpu.pipeline_mode<synchronous>, transform_indices = @transform_3, window_bounds = array<i64: 8, 1>}, {transform_indices = @transform_4, window_bounds = array<i64: 1, 8, 256>}]} {
    %c0 = arith.constant 0 : index
    %c0_0 = arith.constant 0 : index
    %0 = vector.load %arg3[%c0, %c0_0] : memref<8x72xf32, #tpu.memory_space<vmem>>, vector<8x72xf32>
    %c0_1 = arith.constant 0 : index
    %c0_2 = arith.constant 0 : index
    %c0_3 = arith.constant 0 : index
    %1 = vector.load %arg2[%c0_1, %c0_2, %c0_3] : memref<1x72x256xf32, #tpu.memory_space<vmem>>, vector<1x72x256xf32>
    %2 = vector.shape_cast %1 : vector<1x72x256xf32> to vector<72x256xf32>
    %cst = arith.constant dense<0.000000e+00> : vector<8x256xf32>
    %3 = tpu.matmul %0, %2, %cst {dimension_numbers = #tpu.dot_dimension_numbers<[1], [0], [0], [1], [0, 0, 1, 1], [], []>} : vector<8x72xf32>, vector<72x256xf32>, vector<8x256xf32> -> vector<8x256xf32>
    %c0_4 = arith.constant 0 : index
    %c0_5 = arith.constant 0 : index
    %4 = vector.load %arg4[%c0_4, %c0_5] : memref<8x1xf32, #tpu.memory_space<vmem>>, vector<8x1xf32>
    %5 = vector.broadcast %4 : vector<8x1xf32> to vector<8x256xf32>
    %6 = arith.addf %3, %5 : vector<8x256xf32>
    %c0_6 = arith.constant 0 : index
    %c0_7 = arith.constant 0 : index
    %7 = vector.load %arg5[%c0_6, %c0_7] : memref<8x1xf32, #tpu.memory_space<vmem>>, vector<8x1xf32>
    %cst_8 = arith.constant 0.000000e+00 : f32
    %8 = vector.broadcast %cst_8 : f32 to vector<8x256xf32>
    %9 = arith.cmpf oge, %6, %8 : vector<8x256xf32>
    %10 = vector.broadcast %7 : vector<8x1xf32> to vector<8x256xf32>
    %11 = arith.mulf %10, %6 : vector<8x256xf32>
    %12 = arith.select %9, %6, %11 : vector<8x256xi1>, vector<8x256xf32>
    %c0_9 = arith.constant 0 : index
    %c0_10 = arith.constant 0 : index
    %c0_11 = arith.constant 0 : index
    %13 = vector.load %arg6[%c0_9, %c0_10, %c0_11] : memref<1x8x256xf32, #tpu.memory_space<vmem>>, vector<1x8x256xf32>
    %14 = vector.shape_cast %13 : vector<1x8x256xf32> to vector<8x256xf32>
    %15 = vector.shape_cast %12 : vector<8x256xf32> to vector<1x8x256xf32>
    tpu.vector_store %arg6[%c0_9, %c0_10, %c0_11], %15 {strides = array<i32>} : memref<1x8x256xf32, #tpu.memory_space<vmem>>, vector<1x8x256xf32>,
    return
  }
  func.func @transform_0(%arg0: i32, %arg1: i32) -> (i32, i32, i32) {
    %c0_i32 = arith.constant 0 : i32
    %c0_i32_0 = arith.constant 0 : i32
    return %arg0, %c0_i32, %arg1 : i32, i32, i32
  }
  func.func @transform_1(%arg0: i32, %arg1: i32) -> (i32, i32) {
    %c0_i32 = arith.constant 0 : i32
    %c0_i32_0 = arith.constant 0 : i32
    %c0_i32_1 = arith.constant 0 : i32
    return %c0_i32, %c0_i32_0 : i32, i32
  }
  func.func @transform_2(%arg0: i32, %arg1: i32) -> (i32, i32) {
    %c0_i32 = arith.constant 0 : i32
    %c0_i32_0 = arith.constant 0 : i32
    %c0_i32_1 = arith.constant 0 : i32
    return %c0_i32, %c0_i32_0 : i32, i32
  }
  func.func @transform_3(%arg0: i32, %arg1: i32) -> (i32, i32) {
    %c0_i32 = arith.constant 0 : i32
    %c0_i32_0 = arith.constant 0 : i32
    %c0_i32_1 = arith.constant 0 : i32
    return %c0_i32, %c0_i32_0 : i32, i32
  }
  func.func @transform_4(%arg0: i32, %arg1: i32) -> (i32, i32, i32) {
    %c0_i32 = arith.constant 0 : i32
    %c0_i32_0 = arith.constant 0 : i32
    return %arg0, %c0_i32, %arg1 : i32, i32, i32
  }
}

</mosaic_0001>

<bundles_post_ra>
// kernel: cross_scale_attention_forward.4
= control target key start
LH: loop header
LB: loop body
LE: loop exit
PB: predicated region body
PF: predicated region fallthrough
CT: control target
= control target key end

     0   :  { %s517_s15 = smov 0   ;;  %s519_s16 = smov 0   ;;  %s572_s0 = inlined_call_operand.vmem [shape: f32[2,8,256], index: 0, kind: input, shape index: {}]   ;;  %s573_s1 = inlined_call_operand.vmem [shape: f32[12,8], index: 1, kind: input, shape index: {}]   ;;  %s574_s2 = inlined_call_operand.vmem [shape: f32[12,1], index: 2, kind: input, shape index: {}]   ;;  %s575_s3 = inlined_call_operand.vmem [shape: f32[12,1], index: 3, kind: input, shape index: {}]   ;;  %s576_s4 = inlined_call_operand.vmem [shape: f32[2,12,256], index: 4, kind: output, shape index: {}]  }
   0x1   :  { %s521_s17 = smov 0  }
   0x2 LB: > { %s26_s18 = sadd.s32 1, %s485_s16  ;;  %p425_p0 = scmp.ge.s32.totalorder %s489_s17, 1  ;;  %s489_s17 = sphi %s521_s17, %s14_s17   ;;  %s485_s16 = sphi %s519_s16, %s578_s16   ;;  %s481_s15 = sphi %s517_s15, %s577_s15  }
   0x3   : > { %p28_p1 = scmp.ge.s32.totalorder %s26_s18, 2  ;;  %p183_p2 = scmp.lt.s32.totalorder %s489_s17, 3 }
   0x5   : > { %s580_s18 = smov (%p28_p1, %s26_s18), 0  ;;  %p184_p3 = pnand %p425_p0, %p183_p2 }
   0x6   : > { %p218_p4 = scmp.lt.s32.totalorder (!%p184_p3), %s481_s15, 1 }
   0x7   : > { %187 = sbr.rel (%p184_p3) target bundleno = 157 (0x9d), region = 36 }
   0xc   : > { %v491_v0 = vmov 0   ;;  %v241_v1 = vld [vmem:[%s574_s2] sm:$0xff]  ;;  %s582_s15 = smov (!%p218_p4, %s481_s15), 1  ;;  %vm253_vm0 = vcmask 64512   ;;  %v238_v6 = vld [vmem:[%s573_s1 + $0x8] sm:$0xf] }
   0xd   : > { %465 = vset.pattern.permute.xlu0 %v491_v0  ;;  %466 = vset.pattern.permute.xlu1 %v491_v0  ;;  %v306_v2 = vld [vmem:[%s575_s3] sm:$0xff]  ;;  %s436_s23 = sshll.u32 %s582_s15, 4  ;;  %v242_v7 = vld [vmem:[%s574_s2 + $0x8] sm:$0xf]  ;;  %s437_s9 = sshll.u32 %s582_s15, 5 }
   0xe   : > { %245 = vperm.xlu0 %465, %v241_v1   ;;  %314 = vperm.xlu1 %466, %v306_v2   ;;  %s225_s26 = scalar_lea.vmem %s572_s0, %s436_s23  ;;  %v237_v3 = vld [vmem:[%s573_s1] sm:$0xff]  ;;  %v307_v8 = vld [vmem:[%s575_s3 + $0x8] sm:$0xf]  ;;  %s235_s12 = scalar_lea.vmem %s576_s4, %s437_s9 }
   0xf   : > { %v239_v4 = vld [vmem:[%s225_s26] sm:$0xff]  ;;  %v240_v5 = vld [vmem:[%s225_s26 + $0x8] sm:$0xff] }
  0x10   : > { %275 = vmatpush.msra.mxu0 %v239_v4  ;;  %438 = vmatpush.msra.mxu2 %v239_v4 }
  0x11   : > { %298 = vmatpush.msra.mxu1 %v240_v5  ;;  %439 = vmatpush.msra.mxu3 %v240_v5 }
  0x12   : > { %430 = vmatmul.msk.f32.vlgmr.msra.gmra.mxu0 %vm253_vm0, %v237_v3  ;;  %431 = vmatmul.msk.f32.vlgmr.msra.gmra.mxu2 %vm253_vm0, %v238_v6 }
  0x13   : > { %432 = vmatmul.msk.f32.vlgmr.msra.gmra.mxu1 %vm253_vm0, %v237_v3  ;;  %433 = vmatmul.msk.f32.vlgmr.msra.gmra.mxu3 %vm253_vm0, %v238_v6 }
  0x16   : > { %250 = vperm.xlu0 %465, %v242_v7   ;;  %319 = vperm.xlu1 %466, %v307_v8  }
  0x80   : > { %v246_v9 = vpop.permute.xlu0 %245  ;;  %v315_v10 = vpop.permute.xlu1 %314 }
  0x88   : > { %v251_v18 = vpop.permute.xlu0 %250  ;;  %v320_v23 = vpop.permute.xlu1 %319 }
  0x8f   : > { %v277_v11 = vpop.f32.mrf.mxu0 }
  0x90   : > { %v278_v12 = vadd.f32 %v277_v11, %v246_v9  ;;  %v300_v13 = vpop.f32.mrf.mxu1 }
  0x91   : > { %v301_v14 = vadd.f32 %v300_v13, %v246_v9 }
  0x92   : > { %vm308_vm1 = vcmp.ge.f32.partialorder %v278_v12, 0.0  ;;  %v322_v15 = vmul.f32 %v315_v10, %v278_v12 }
  0x93   : > { %vm309_vm2 = vcmp.ge.f32.partialorder %v301_v14, 0.0  ;;  %v323_v16 = vmul.f32 %v315_v10, %v301_v14 }
  0x94   : > { %v326_v17 = vsel %vm308_vm1, %v278_v12, %v322_v15 }
  0x95   : > { %330 = vst [vmem:[%s235_s12] sm:$0xff] %v326_v17  ;;  %v327_v19 = vsel %vm309_vm2, %v301_v14, %v323_v16  ;;  %v280_v20 = vpop.f32.mrf.mxu2 }
  0x96   : > { %331 = vst [vmem:[%s235_s12 + $0x8] sm:$0xff] %v327_v19  ;;  %v281_v21 = vadd.f32 %v280_v20, %v251_v18  ;;  %v303_v22 = vpop.f32.mrf.mxu3 }
  0x97   : > { %v304_v24 = vadd.f32 %v303_v22, %v251_v18 }
  0x98   : > { %vm310_vm3 = vcmp.ge.f32.partialorder %v281_v21, 0.0  ;;  %v324_v25 = vmul.f32 %v320_v23, %v281_v21 }
  0x99   : > { %vm311_vm4 = vcmp.ge.f32.partialorder %v304_v24, 0.0  ;;  %v325_v26 = vmul.f32 %v320_v23, %v304_v24 }
  0x9a   : > { %v328_v27 = vsel %vm310_vm3, %v281_v21, %v324_v25 }
  0x9b   : > { %332 = vst [vmem:[%s235_s12 + $0x10] sm:$0xf] %v328_v27  ;;  %v329_v28 = vsel %vm311_vm4, %v304_v24, %v325_v26 }
  0x9c   : > { %333 = vst [vmem:[%s235_s12 + $0x18] sm:$0xf] %v329_v28 }
  0x9d PF: > { %s14_s17 = sadd.s32 1, %s489_s17   ;;  %s577_s15 = smov %s485_s16 }
  0x9e   : > { %p11_p5 = scmp.ge.s32.totalorder %s14_s17, 4   ;;  %s578_s16 = smov %s580_s18 }
  0xa0   :  { %13 = sbr.rel (!%p11_p5) target bundleno = 2 (0x2), region = 66 }

// kernel: cross_scale_attention_forward.5
= control target key start
LH: loop header
LB: loop body
LE: loop exit
PB: predicated region body
PF: predicated region fallthrough
CT: control target
= control target key end

     0   :  { %s427_s15 = smov 0   ;;  %s429_s16 = smov 0   ;;  %s469_s0 = inlined_call_operand.vmem [shape: f32[2,8,64], index: 0, kind: input, shape index: {}]   ;;  %s470_s1 = inlined_call_operand.vmem [shape: f32[4,8], index: 1, kind: input, shape index: {}]   ;;  %s471_s2 = inlined_call_operand.vmem [shape: f32[4,1], index: 2, kind: input, shape index: {}]   ;;  %s472_s3 = inlined_call_operand.vmem [shape: f32[4,1], index: 3, kind: input, shape index: {}]   ;;  %s473_s4 = inlined_call_operand.vmem [shape: f32[2,4,64], index: 4, kind: output, shape index: {}]  }
   0x1   :  { %s431_s17 = smov 0  }
   0x2 LB: > { %s26_s18 = sadd.s32 1, %s395_s16  ;;  %p345_p0 = scmp.ge.s32.totalorder %s399_s17, 1  ;;  %s399_s17 = sphi %s431_s17, %s14_s17   ;;  %s395_s16 = sphi %s429_s16, %s475_s16   ;;  %s391_s15 = sphi %s427_s15, %s474_s15  }
   0x3   : > { %p28_p1 = scmp.ge.s32.totalorder %s26_s18, 2  ;;  %p180_p2 = scmp.lt.s32.totalorder %s399_s17, 3 }
   0x5   : > { %s477_s18 = smov (%p28_p1, %s26_s18), 0  ;;  %p181_p3 = pnand %p345_p0, %p180_p2 }
   0x6   : > { %p210_p4 = scmp.lt.s32.totalorder (!%p181_p3), %s391_s15, 1 }
   0x7   : > { %184 = sbr.rel (%p181_p3) target bundleno = 149 (0x95), region = 36 }
   0xc   : > { %v226_v0 = vld [vmem:[%s471_s2] sm:$0xf]  ;;  %v401_v1 = vmov 0   ;;  %s479_s15 = smov (!%p210_p4, %s391_s15), 1  ;;  %vm232_vm0 = vcmask 64512   ;;  %vm265_vm2 = vcmask 519168  }
   0xd   : > { %376 = vset.pattern.permute.xlu0 %v401_v1  ;;  %s346_s21 = sshll.u32 %s479_s15, 3  ;;  %v224_v2 = vld [vmem:[%s470_s1] sm:$0xf]  ;;  %s347_s29 = sshll.u32 %s479_s15, 2 }
   0xe   : > { %229 = vperm.xlu0 %376, %v226_v0   ;;  %s216_s24 = scalar_lea.vmem %s469_s0, %s346_s21  ;;  %v256_v4 = vld [vmem:[%s472_s3] sm:$0xf]  ;;  %s223_s6 = scalar_lea.vmem %s473_s4, %s347_s29 }
   0xf   : > { %v225_v3 = vld [vmem:[%s216_s24] sm:$0xff] }
  0x10   : > { %251 = vmatpush.msra.mxu0 %v225_v3 }
  0x11   : > { %348 = vmatmul.msk.f32.vlgmr.msra.gmra.mxu0 %vm232_vm0, %v224_v2 }
  0x16   : > { %260 = vperm.xlu0 %376, %v256_v4  }
  0x80   : > { %v230_v5 = vpop.permute.xlu0 %229 }
  0x88   : > { %v261_v8 = vpop.permute.xlu0 %260 }
  0x8e   : > { %v253_v6 = vpop.f32.mrf.mxu0 }
  0x8f   : > { %v254_v7 = vadd.f32 %v253_v6, %v230_v5 }
  0x91   : > { %vm257_vm1 = vcmp.ge.f32.partialorder %v254_v7, 0.0  ;;  %v263_v9 = vmul.f32 %v261_v8, %v254_v7 }
  0x93   : > { %v264_v10 = vsel %vm257_vm1, %v254_v7, %v263_v9 }
  0x94   : > { %266 = vst.msk [vmem:[%s223_s6] sm:$0xf] %vm265_vm2, %v264_v10 }
  0x95 PF: > { %s14_s17 = sadd.s32 1, %s399_s17   ;;  %s474_s15 = smov %s395_s16 }
  0x96   : > { %p11_p5 = scmp.ge.s32.totalorder %s14_s17, 4   ;;  %s475_s16 = smov %s477_s18 }
  0x98   :  { %13 = sbr.rel (!%p11_p5) target bundleno = 2 (0x2), region = 66 }

// kernel: cross_scale_attention_forward.6
= control target key start
LH: loop header
LB: loop body
LE: loop exit
PB: predicated region body
PF: predicated region fallthrough
CT: control target
= control target key end

     0   :  { %s1987_s12 = smov 0   ;;  %s1989_s13 = smov 0   ;;  %s2407_s0 = inlined_call_operand.vmem [shape: bf16[2,64,36], index: 0, kind: input, shape index: {}]   ;;  %s2408_s1 = inlined_call_operand.vmem [shape: bf16[2,36,256], index: 1, kind: input, shape index: {}]   ;;  %s2409_s2 = inlined_call_operand.vmem [shape: bf16[2,288,64], index: 2, kind: input, shape index: {}]   ;;  %s2410_s3 = inlined_call_operand.vmem [shape: f32[2,288,256], index: 3, kind: output, shape index: {}]  }
   0x1   :  { %s1991_s14 = smov 0  }
   0x2 LB: > { %s32_s15 = sadd.s32 1, %s1959_s13  ;;  %p1685_p0 = scmp.ge.s32.totalorder %s1963_s14, 1  ;;  %s1963_s14 = sphi %s1991_s14, %s13_s14   ;;  %s1959_s13 = sphi %s1989_s13, %s2414_s13   ;;  %s1955_s12 = sphi %s1987_s12, %s2413_s12  }
   0x3   : > { %p34_p1 = scmp.ge.s32.totalorder %s32_s15, 2  ;;  %p197_p2 = scmp.lt.s32.totalorder %s1963_s14, 3 }
   0x5   : > { %s2416_s15 = smov (%p34_p1, %s32_s15), 0  ;;  %p198_p3 = pnand %p1685_p0, %p197_p2 }
   0x6   : > { %p247_p4 = scmp.lt.s32.totalorder (!%p198_p3), %s1955_s12, 1 }
   0x7   : > { %201 = sbr.rel (%p198_p3) target bundleno = 588 (0x24c), region = 32 }
   0xc   : > { %s2418_s12 = smov (!%p247_p4, %s1955_s12), 1  ;;  %vm474_vm0 = vcmask 1041408   ;;  %vm461_vm1 = vcmask 293888   ;;  %v289_v33 = vlaneseq  ;;  %v1965_v35 = vmov -inf  }
   0xd   : > { %s1876_s16 = smul.u32 40, %s2418_s12  ;;  %s1841_s20 = sshll.u32 %s2418_s12, 5  ;;  %v1966_v38 = vmov 0.0   ;;  %vm585_vm3 = vcmask 1040384   ;;  %vm931_vm4 = vcmask 523264  }
   0xe   : > { %s254_s23 = scalar_lea.vmem %s2407_s0, %s1841_s20  ;;  %vm2015_vm2 = vcmp.lt.s32.totalorder %v289_v33, 256  ;;  %s1877_s24 = smul.u32 144, %s2418_s12 }
   0xf   : > { %s264_s19 = scalar_lea.vmem %s2408_s1, %s1876_s16  ;;  %v1842_v19 = vld [vmem:[%s254_s23] sm:$0xff]  ;;  %v1843_v20 = vld [vmem:[%s254_s23 + $0x8] sm:$0xff]  ;;  %v1844_v21 = vld [vmem:[%s254_s23 + $0x10] sm:$0xff]  ;;  %293 = vst.msk [vmem:[#allocation2] sm:$0x3] %vm2015_vm2, %v1965_v35  ;;  %s1878_s28 = smul.u32 576, %s2418_s12 }
  0x10   : > { %v379_v0 = vld [vmem:[%s264_s19 + $0x20] sm:$0x33]  ;;  %v1717_v3 = vld [vmem:[%s264_s19 + $0x10] sm:$0xf]  ;;  %v1849_v6 = vld [vmem:[%s264_s19 + $0x14] sm:$0xf0]  ;;  %s2100_s27 = scalar_lea.vmem %s2409_s2, %s1877_s24 }
  0x11   : > { %v449_v1 = vunpack.c.l.b16 %v379_v0  ;;  %v450_v2 = vunpack.c.h.b16 %v379_v0  ;;  %v1848_v7 = vld [vmem:[%s264_s19 + $0x14] sm:$0xf]  ;;  %v1719_v8 = vld [vmem:[%s264_s19 + $0x18] sm:$0xf0]  ;;  %v1718_v11 = vor.u32 %v1849_v6, %v1717_v3  ;;  %v1709_v13 = vld [vmem:[%s264_s19] sm:$0xf]  ;;  %s2173_s4 = scalar_lea.vmem %s2410_s3, %s1878_s28 }
  0x12   : > { %v1722_v12 = vor.u32 %v1848_v7, %v1719_v8  ;;  %v1847_v14 = vld [vmem:[%s264_s19 + $0x4] sm:$0xf0]  ;;  %v1846_v15 = vld [vmem:[%s264_s19 + $0x4] sm:$0xf]  ;;  %v1711_v16 = vld [vmem:[%s264_s19 + $0x8] sm:$0xf0] }
  0x13   : > { %v455_v4 = vpack.c.b16 %v449_v1, %v449_v1  ;;  %v456_v5 = vpack.c.b16 %v450_v2, %v450_v2  ;;  %v1710_v17 = vor.u32 %v1847_v14, %v1709_v13  ;;  %v1714_v18 = vor.u32 %v1846_v15, %v1711_v16  ;;  %v1845_v22 = vld [vmem:[%s254_s23 + $0x18] sm:$0xff]  ;;  %294 = vst.msk [vmem:[#allocation3] sm:$0x3] %vm2015_vm2, %v1966_v38 }
  0x14   : > { %v1853_v34 = vld [vmem:[%s2100_s27 + $0x18] sm:$0xff] }
  0x15   : > { %v476_v9 = vsel %vm474_vm0, %v455_v4, 0  ;;  %v479_v10 = vsel %vm474_vm0, %v456_v5, 0 }
  0x16   : > { %486 = vmatpush.bf16.msra.mxu0 %v476_v9  ;;  %515 = vmatpush.bf16.msra.mxu1 %v479_v10 }
  0x1a   : > { %487 = vmatpush.bf16.msra.mxu0 %v1718_v11  ;;  %516 = vmatpush.bf16.msra.mxu1 %v1722_v12 }
  0x1e   : > { %488 = vmatpush.bf16.msra.mxu0 %v1710_v17  ;;  %517 = vmatpush.bf16.msra.mxu1 %v1714_v18 }
  0x21   : > { %1723 = vmatmul.msk.bf16.vlgmr.msra.gmra.mxu0 %vm461_vm1, %v1842_v19  ;;  %1727 = vmatmul.msk.bf16.vlgmr.msra.gmra.mxu1 %vm461_vm1, %v1842_v19 }
  0x31   : > { %1724 = vmatmul.msk.bf16.gmra.mxu0 %vm461_vm1, %v1843_v20  ;;  %1728 = vmatmul.msk.bf16.gmra.mxu1 %vm461_vm1, %v1843_v20 }
  0x41   : > { %1725 = vmatmul.msk.bf16.gmra.mxu0 %vm461_vm1, %v1844_v21  ;;  %1729 = vmatmul.msk.bf16.gmra.mxu1 %vm461_vm1, %v1844_v21  ;;  %v2059_v21 = vld [vmem:[#allocation2] sm:$0x3] }
  0x51   : > { %1726 = vmatmul.msk.bf16.gmra.mxu0 %vm461_vm1, %v1845_v22  ;;  %1730 = vmatmul.msk.bf16.gmra.mxu1 %vm461_vm1, %v1845_v22 }
  0x9e   : > { %v490_v23 = vpop.f32.mrf.mxu0  ;;  %v519_v24 = vpop.f32.mrf.mxu1 }
  0x9f   : > { %v539_v45 = vmul.f32 10.0, %v490_v23  ;;  %v540_v46 = vmul.f32 10.0, %v519_v24 }
  0xa6   : > { %v492_v25 = vpop.f32.mrf.mxu0  ;;  %v521_v26 = vpop.f32.mrf.mxu1 }
  0xa7   : > { %v541_v49 = vmul.f32 10.0, %v492_v25  ;;  %v542_v50 = vmul.f32 10.0, %v521_v26 }
  0xae   : > { %v495_v27 = vpop.f32.mrf.mxu0  ;;  %v524_v28 = vpop.f32.mrf.mxu1 }
  0xaf   : > { %v2023_v41 = vmul.f32 10.0, %v495_v27  ;;  %v2025_v42 = vmul.f32 10.0, %v524_v28 }
  0xb1   : > { %v556_v53 = vmax.f32 %v539_v45, %v2023_v41  ;;  %v569_v54 = vmax.f32 %v540_v46, %v2025_v42 }
  0xb6   : > { %v497_v29 = vpop.f32.mrf.mxu0  ;;  %v526_v30 = vpop.f32.mrf.mxu1 }
  0xb7   : > { %v2027_v43 = vmul.f32 10.0, %v497_v29  ;;  %v2029_v44 = vmul.f32 10.0, %v526_v30 }
  0xb9   : > { %v557_v55 = vmax.f32 %v541_v49, %v2027_v43  ;;  %v570_v56 = vmax.f32 %v542_v50, %v2029_v44 }
  0xbe   : > { %v500_v31 = vpop.f32.mrf.mxu0  ;;  %v529_v32 = vpop.f32.mrf.mxu1 }
  0xbf   : > { %v2031_v47 = vmul.f32 10.0, %v500_v31  ;;  %v2033_v48 = vmul.f32 10.0, %v529_v32 }
  0xc1   : > { %v558_v59 = vmax.f32 %v556_v53, %v2031_v47  ;;  %v571_v60 = vmax.f32 %v569_v54, %v2033_v48 }
  0xc6   : > { %v502_v36 = vpop.f32.mrf.mxu0  ;;  %v531_v37 = vpop.f32.mrf.mxu1 }
  0xc7   : > { %v2035_v51 = vmul.f32 10.0, %v502_v36  ;;  %v2037_v52 = vmul.f32 10.0, %v531_v37 }
  0xc9   : > { %v559_v63 = vmax.f32 %v557_v55, %v2035_v51  ;;  %v572_v0 = vmax.f32 %v570_v56, %v2037_v52 }
  0xce   : > { %v505_v39 = vpop.f32.mrf.mxu0  ;;  %v534_v40 = vpop.f32.mrf.mxu1 }
  0xcf   : > { %v2043_v57 = vmul.f32 10.0, %v505_v39  ;;  %v2045_v58 = vmul.f32 10.0, %v534_v40 }
  0xd1   : > { %v560_v3 = vmax.f32 %v558_v59, %v2043_v57  ;;  %v573_v4 = vmax.f32 %v571_v60, %v2045_v58 }
  0xd6   : > { %v507_v61 = vpop.f32.mrf.mxu0  ;;  %v536_v62 = vpop.f32.mrf.mxu1 }
  0xd7   : > { %v2051_v1 = vmul.f32 10.0, %v507_v61  ;;  %v2053_v2 = vmul.f32 10.0, %v536_v62 }
  0xd9   : > { %v561_v5 = vmax.f32 %v559_v63, %v2051_v1  ;;  %v574_v6 = vmax.f32 %v572_v0, %v2053_v2 }
  0xdb   : > { %v562_v7 = vmax.f32 %v560_v3, %v561_v5  ;;  %v575_v8 = vmax.f32 %v573_v4, %v574_v6 }
  0xdd   : > { %v563_v9 = vrot.slane %v562_v7, 4  ;;  %v576_v10 = vrot.slane %v575_v8, 4 }
  0xdf   : > { %v564_v11 = vmax.f32 %v562_v7, %v563_v9  ;;  %v577_v12 = vmax.f32 %v575_v8, %v576_v10 }
  0xe1   : > { %v565_v13 = vrot.slane %v564_v11, 2  ;;  %v578_v14 = vrot.slane %v577_v12, 2 }
  0xe3   : > { %v566_v15 = vmax.f32 %v564_v11, %v565_v13  ;;  %v579_v16 = vmax.f32 %v577_v12, %v578_v14 }
  0xe5   : > { %v567_v17 = vrot.slane %v566_v15, 1  ;;  %v580_v18 = vrot.slane %v579_v16, 1 }
  0xe7   : > { %v581_v19 = vmax.f32 %v579_v16, %v580_v18  ;;  %v568_v20 = vmax.f32 %v566_v15, %v567_v17 }
  0xe9   : > { %v584_v22 = vrot.slane %v581_v19, 7 }
  0xeb   : > { %v586_v23 = vsel %vm585_vm3, %v568_v20, %v584_v22 }
  0xec   : > { %v2063_v24 = vmax.f32 %v2059_v21, %v586_v23 }
  0xee   : > { %v593_v25 = vperm.slane %v2063_v24, 0  ;;  %v594_v26 = vperm.slane %v2063_v24, 1  ;;  %1328 = vst.msk [vmem:[#allocation2] sm:$0x3] %vm2015_vm2, %v2063_v24  ;;  %v589_v23 = vsub.f32 %v2059_v21, %v2063_v24 }
  0xf0   : > { %v597_v27 = vsub.f32 %v539_v45, %v593_v25  ;;  %v598_v28 = vsub.f32 %v540_v46, %v594_v26  ;;  %v599_v29 = vsub.f32 %v541_v49, %v593_v25  ;;  %v600_v30 = vsub.f32 %v542_v50, %v594_v26 }
  0xf1   : > { %v601_v31 = vsub.f32 %v2023_v41, %v593_v25  ;;  %v602_v32 = vsub.f32 %v2025_v42, %v594_v26  ;;  %v603_v33 = vsub.f32 %v2027_v43, %v593_v25  ;;  %v604_v37 = vsub.f32 %v2029_v44, %v594_v26 }
  0xf2   : > { %v613_v35 = vmul.f32 1.442695, %v597_v27  ;;  %v615_v36 = vmul.f32 1.442695, %v598_v28  ;;  %v617_v38 = vmul.f32 1.442695, %v599_v29  ;;  %v605_v40 = vsub.f32 %v2031_v47, %v593_v25 }
  0xf3   : > { %v619_v39 = vmul.f32 1.442695, %v600_v30  ;;  %v621_v53 = vmul.f32 1.442695, %v601_v31  ;;  %v606_v45 = vsub.f32 %v2033_v48, %v594_v26  ;;  %v623_v46 = vmul.f32 1.442695, %v602_v32 }
  0xf4   : > { %1905 = vpow2.f32 %v613_v35  ;;  %v607_v41 = vsub.f32 %v2035_v51, %v593_v25  ;;  %v625_v42 = vmul.f32 1.442695, %v603_v33  ;;  %v608_v43 = vsub.f32 %v2037_v52, %v594_v26 }
  0xf5   : > { %1907 = vpow2.f32 %v615_v36  ;;  %v627_v49 = vmul.f32 1.442695, %v604_v37  ;;  %v609_v44 = vsub.f32 %v2043_v57, %v593_v25  ;;  %v629_v50 = vmul.f32 1.442695, %v605_v40 }
  0xf6   : > { %1909 = vpow2.f32 %v617_v38  ;;  %v610_v47 = vsub.f32 %v2045_v58, %v594_v26  ;;  %v631_v54 = vmul.f32 1.442695, %v606_v45  ;;  %v611_v48 = vsub.f32 %v2051_v1, %v593_v25 }
  0xf7   : > { %1911 = vpow2.f32 %v619_v39  ;;  %v633_v51 = vmul.f32 1.442695, %v607_v41  ;;  %v612_v52 = vsub.f32 %v2053_v2, %v594_v26  ;;  %v635_v59 = vmul.f32 1.442695, %v608_v43 }
  0xf8   : > { %1913 = vpow2.f32 %v621_v53  ;;  %v637_v57 = vmul.f32 1.442695, %v609_v44  ;;  %v639_v58 = vmul.f32 1.442695, %v610_v47  ;;  %v641_v0 = vmul.f32 1.442695, %v611_v48 }
  0xf9   : > { %1915 = vpow2.f32 %v623_v46  ;;  %v643_v3 = vmul.f32 1.442695, %v612_v52  ;;  %v590_v32 = vmul.f32 1.442695, %v589_v23  ;;  %v1850_v47 = vld [vmem:[%s2100_s27] sm:$0xff] }
  0xfa   : > { %v2080_v55 = vpop.eup %1905  ;;  %1917 = vpow2.f32 %v625_v42 }
  0xfb   : > { %v2083_v56 = vpop.eup %1907  ;;  %1919 = vpow2.f32 %v627_v49  ;;  %v645_v49 = vld [vmem:[#allocation3] sm:$0x3] }
  0xfc   : > { %v2086_v60 = vpop.eup %1909  ;;  %1921 = vpow2.f32 %v629_v50 }
  0xfd   : > { %v2088_v61 = vpop.eup %1911  ;;  %1923 = vpow2.f32 %v631_v54  ;;  %v647_v62 = vadd.f32 %v2086_v60, %v2080_v55  ;;  %v833_v42 = vpack.c.bf16 %v2086_v60, %v2080_v55  ;;  %v1857_v54 = vld [vmem:[%s2100_s27 + $0x38] sm:$0xff]  ;;  %v1858_v60 = vld [vmem:[%s2100_s27 + $0x40] sm:$0xff] }
  0xfe   : > { %v1914_v63 = vpop.eup %1913  ;;  %1925 = vpow2.f32 %v633_v51  ;;  %v660_v1 = vadd.f32 %v2088_v61, %v2083_v56  ;;  %v834_v50 = vpack.c.bf16 %v2088_v61, %v2083_v56  ;;  %v1859_v61 = vld [vmem:[%s2100_s27 + $0x48] sm:$0xff] }
  0xff   : > { %v1916_v2 = vpop.eup %1915  ;;  %1927 = vpow2.f32 %v635_v59  ;;  %v648_v4 = vadd.f32 %v1914_v63, %v647_v62  ;;  %v1851_v59 = vld [vmem:[%s2100_s27 + $0x8] sm:$0xff]  ;;  %v1854_v62 = vld [vmem:[%s2100_s27 + $0x20] sm:$0xff] }
 0x100   : > { %v1918_v5 = vpop.eup %1917  ;;  %1929 = vpow2.f32 %v637_v57  ;;  %v661_v6 = vadd.f32 %v1916_v2, %v660_v1  ;;  %v1852_v57 = vld [vmem:[%s2100_s27 + $0x10] sm:$0xff]  ;;  %v1862_v1 = vld [vmem:[%s2100_s27 + $0x60] sm:$0xff] }
 0x101   : > { %v1920_v7 = vpop.eup %1919  ;;  %1931 = vpow2.f32 %v639_v58  ;;  %v649_v8 = vadd.f32 %v1918_v5, %v648_v4  ;;  %v835_v40 = vpack.c.bf16 %v1918_v5, %v1914_v63  ;;  %v1860_v58 = vld [vmem:[%s2100_s27 + $0x50] sm:$0xff]  ;;  %v1861_v63 = vld [vmem:[%s2100_s27 + $0x58] sm:$0xff] }
 0x102   : > { %v1922_v9 = vpop.eup %1921  ;;  %1933 = vpow2.f32 %v641_v0  ;;  %v662_v10 = vadd.f32 %v1920_v7, %v661_v6  ;;  %v836_v45 = vpack.c.bf16 %v1920_v7, %v1916_v2  ;;  %v1855_v0 = vld [vmem:[%s2100_s27 + $0x28] sm:$0xff]  ;;  %v1856_v2 = vld [vmem:[%s2100_s27 + $0x30] sm:$0xff] }
 0x103   : > { %v1924_v11 = vpop.eup %1923  ;;  %1935 = vpow2.f32 %v643_v3  ;;  %v650_v12 = vadd.f32 %v1922_v9, %v649_v8  ;;  %v1863_v3 = vld [vmem:[%s2100_s27 + $0x68] sm:$0xff]  ;;  %v1864_v4 = vld [vmem:[%s2100_s27 + $0x70] sm:$0xff] }
 0x104   : > { %v1926_v13 = vpop.eup %1925  ;;  %v663_v14 = vadd.f32 %v1924_v11, %v662_v10  ;;  %1937 = vpow2.f32 %v590_v32  ;;  %v1865_v10 = vld [vmem:[%s2100_s27 + $0x78] sm:$0xff] }
 0x105   : > { %v1928_v15 = vpop.eup %1927  ;;  %v651_v16 = vadd.f32 %v1926_v13, %v650_v12  ;;  %v837_v36 = vpack.c.bf16 %v1926_v13, %v1922_v9 }
 0x106   : > { %v1930_v17 = vpop.eup %1929  ;;  %v664_v18 = vadd.f32 %v1928_v15, %v663_v14  ;;  %v838_v38 = vpack.c.bf16 %v1928_v15, %v1924_v11 }
 0x107   : > { %v1932_v19 = vpop.eup %1931  ;;  %v652_v20 = vadd.f32 %v1930_v17, %v651_v16 }
 0x108   : > { %v1934_v22 = vpop.eup %1933  ;;  %v665_v25 = vadd.f32 %v1932_v19, %v664_v18 }
 0x109   : > { %v1936_v26 = vpop.eup %1935  ;;  %v653_v27 = vadd.f32 %v1934_v22, %v652_v20  ;;  %v839_v28 = vpack.c.bf16 %v1934_v22, %v1930_v17 }
 0x10a   : > { %v666_v29 = vadd.f32 %v1936_v26, %v665_v25  ;;  %v840_v30 = vpack.c.bf16 %v1936_v26, %v1932_v19  ;;  %v2104_v43 = vpop.eup %1937 }
 0x10b   : > { %v654_v31 = vrot.slane %v653_v27, 4  ;;  %990 = vmatpush.bf16.msrb.mxu0 %v839_v28  ;;  %1868 = vmatpush.bf16.msra.mxu2 %v839_v28  ;;  %v646_v55 = vmul.f32 %v2104_v43, %v645_v49  ;;  %v757_v6 = vperm.slane %v2104_v43, 0  ;;  %v758_v7 = vperm.slane %v2104_v43, 1 }
 0x10c   : > { %v667_v33 = vrot.slane %v666_v29, 4  ;;  %1089 = vmatpush.bf16.msrb.mxu1 %v840_v30  ;;  %1872 = vmatpush.bf16.msra.mxu3 %v840_v30 }
 0x10d   : > { %v655_v35 = vadd.f32 %v654_v31, %v653_v27  ;;  %v2160_v9 = vmul.f32 0.0, %v757_v6  ;;  %v2163_v11 = vmul.f32 0.0, %v758_v7 }
 0x10e   : > { %v668_v37 = vadd.f32 %v667_v33, %v666_v29 }
 0x10f   : > { %v656_v39 = vrot.slane %v655_v35, 2  ;;  %991 = vmatpush.bf16.msrb.mxu0 %v837_v36  ;;  %1869 = vmatpush.bf16.msra.mxu2 %v837_v36 }
 0x110   : > { %v669_v21 = vrot.slane %v668_v37, 2  ;;  %1090 = vmatpush.bf16.msrb.mxu1 %v838_v38  ;;  %1873 = vmatpush.bf16.msra.mxu3 %v838_v38  ;;  %v1866_v38 = vld [vmem:[%s2100_s27 + $0x80] sm:$0xff] }
 0x111   : > { %v657_v24 = vadd.f32 %v656_v39, %v655_v35 }
 0x112   : > { %v670_v53 = vadd.f32 %v669_v21, %v668_v37 }
 0x113   : > { %992 = vmatpush.bf16.msrb.mxu0 %v835_v40  ;;  %1870 = vmatpush.bf16.msra.mxu2 %v835_v40  ;;  %v658_v46 = vrot.slane %v657_v24, 1 }
 0x114   : > { %v671_v41 = vrot.slane %v670_v53, 1  ;;  %1091 = vmatpush.bf16.msrb.mxu1 %v836_v45  ;;  %1874 = vmatpush.bf16.msra.mxu3 %v836_v45 }
 0x115   : > { %v659_v48 = vadd.f32 %v658_v46, %v657_v24 }
 0x116   : > { %v672_v44 = vadd.f32 %v671_v41, %v670_v53 }
 0x117   : > { %993 = vmatpush.bf16.msrb.mxu0 %v833_v42  ;;  %1871 = vmatpush.bf16.msra.mxu2 %v833_v42 }
 0x118   : > { %v675_v51 = vrot.slane %v672_v44, 7  ;;  %1092 = vmatpush.bf16.msrb.mxu1 %v834_v50  ;;  %1875 = vmatpush.bf16.msra.mxu3 %v834_v50 }
 0x11a   : > { %v676_v52 = vsel %vm585_vm3, %v659_v48, %v675_v51  ;;  %1803 = vmatmul.msk.bf16.vlgmr.msrb.gmra.mxu0 %vm931_vm4, %v1850_v47  ;;  %1810 = vmatmul.msk.bf16.vlgmr.msra.gmra.mxu2 %vm931_vm4, %v1857_v54 }
 0x11b   : > { %v678_v56 = vadd.f32 %v676_v52, %v646_v55  ;;  %1821 = vmatmul.msk.bf16.vlgmr.msrb.gmra.mxu1 %vm931_vm4, %v1850_v47  ;;  %1828 = vmatmul.msk.bf16.vlgmr.msra.gmra.mxu3 %vm931_vm4, %v1857_v54 }
 0x11d   : > { %683 = vst.msk [vmem:[#allocation3] sm:$0x3] %vm2015_vm2, %v678_v56 }
 0x124   : > { %v1332_v5 = vld [vmem:[#allocation3] sm:$0x3] }
 0x125   : > { %1939 = vrcp.f32 %v1332_v5 }
 0x12a   : > { %1804 = vmatmul.msk.bf16.gmra.mxu0 %vm931_vm4, %v1851_v59  ;;  %1811 = vmatmul.msk.bf16.gmra.mxu2 %vm931_vm4, %v1858_v60 }
 0x12b   : > { %1822 = vmatmul.msk.bf16.gmra.mxu1 %vm931_vm4, %v1851_v59  ;;  %1829 = vmatmul.msk.bf16.gmra.mxu3 %vm931_vm4, %v1858_v60  ;;  %v1940_v8 = vpop.eup %1939 }
 0x12c   : > { %v2165_v13 = vperm.slane %v1940_v8, 0  ;;  %v2168_v16 = vperm.slane %v1940_v8, 1 }
 0x13a   : > { %1805 = vmatmul.msk.bf16.gmra.mxu0 %vm931_vm4, %v1852_v57  ;;  %1812 = vmatmul.msk.bf16.gmra.mxu2 %vm931_vm4, %v1859_v61 }
 0x13b   : > { %1823 = vmatmul.msk.bf16.gmra.mxu1 %vm931_vm4, %v1852_v57  ;;  %1830 = vmatmul.msk.bf16.gmra.mxu3 %vm931_vm4, %v1859_v61 }
 0x14a   : > { %1806 = vmatmul.msk.bf16.gmra.mxu0 %vm931_vm4, %v1853_v34  ;;  %1813 = vmatmul.msk.bf16.gmra.mxu2 %vm931_vm4, %v1860_v58 }
 0x14b   : > { %1824 = vmatmul.msk.bf16.gmra.mxu1 %vm931_vm4, %v1853_v34  ;;  %1831 = vmatmul.msk.bf16.gmra.mxu3 %vm931_vm4, %v1860_v58  ;;  %v1867_v34 = vld [vmem:[%s2100_s27 + $0x88] sm:$0xff] }
 0x15a   : > { %1807 = vmatmul.msk.bf16.gmra.mxu0 %vm931_vm4, %v1854_v62  ;;  %1814 = vmatmul.msk.bf16.gmra.mxu2 %vm931_vm4, %v1861_v63 }
 0x15b   : > { %1825 = vmatmul.msk.bf16.gmra.mxu1 %vm931_vm4, %v1854_v62  ;;  %1832 = vmatmul.msk.bf16.gmra.mxu3 %vm931_vm4, %v1861_v63 }
 0x16a   : > { %1808 = vmatmul.msk.bf16.gmra.mxu0 %vm931_vm4, %v1855_v0  ;;  %1815 = vmatmul.msk.bf16.gmra.mxu2 %vm931_vm4, %v1862_v1 }
 0x16b   : > { %1826 = vmatmul.msk.bf16.gmra.mxu1 %vm931_vm4, %v1855_v0  ;;  %1833 = vmatmul.msk.bf16.gmra.mxu3 %vm931_vm4, %v1862_v1 }
 0x17a   : > { %1809 = vmatmul.msk.bf16.gmra.mxu0 %vm931_vm4, %v1856_v2  ;;  %1816 = vmatmul.msk.bf16.gmra.mxu2 %vm931_vm4, %v1863_v3 }
 0x17b   : > { %1827 = vmatmul.msk.bf16.gmra.mxu1 %vm931_vm4, %v1856_v2  ;;  %1834 = vmatmul.msk.bf16.gmra.mxu3 %vm931_vm4, %v1863_v3 }
 0x18a   : > { %1817 = vmatmul.msk.bf16.gmra.mxu2 %vm931_vm4, %v1864_v4 }
 0x18b   : > { %1835 = vmatmul.msk.bf16.gmra.mxu3 %vm931_vm4, %v1864_v4 }
 0x197   : > { %v995_v12 = vpop.f32.mrf.mxu0 }
 0x198   : > { %v1184_v14 = vadd.f32 %v995_v12, %v2160_v9  ;;  %v1094_v15 = vpop.f32.mrf.mxu1 }
 0x199   : > { %v1185_v17 = vadd.f32 %v1094_v15, %v2163_v11 }
 0x19a   : > { %v1411_v18 = vmul.f32 %v2165_v13, %v1184_v14  ;;  %1818 = vmatmul.msk.bf16.gmra.mxu2 %vm931_vm4, %v1865_v10 }
 0x19b   : > { %v1412_v19 = vmul.f32 %v2168_v16, %v1185_v17  ;;  %1836 = vmatmul.msk.bf16.gmra.mxu3 %vm931_vm4, %v1865_v10 }
 0x19c   : > { %1483 = vst [vmem:[%s2173_s4] sm:$0xff] %v1411_v18 }
 0x19d   : > { %1484 = vst [vmem:[%s2173_s4 + $0x8] sm:$0xff] %v1412_v19  ;;  %v1030_v20 = vpop.f32.mrf.mxu2 }
 0x19e   : > { %v1212_v22 = vadd.f32 %v1030_v20, %v2160_v9  ;;  %v1129_v23 = vpop.f32.mrf.mxu3 }
 0x19f   : > { %v1213_v25 = vadd.f32 %v1129_v23, %v2163_v11  ;;  %v997_v26 = vpop.f32.mrf.mxu0 }
 0x1a0   : > { %v1439_v27 = vmul.f32 %v2165_v13, %v1212_v22  ;;  %v1186_v28 = vadd.f32 %v997_v26, %v2160_v9  ;;  %v1096_v29 = vpop.f32.mrf.mxu1 }
 0x1a1   : > { %v1440_v30 = vmul.f32 %v2168_v16, %v1213_v25  ;;  %v1187_v31 = vadd.f32 %v1096_v29, %v2163_v11 }
 0x1a2   : > { %1511 = vst [vmem:[%s2173_s4 + $0xe0] sm:$0xff] %v1439_v27  ;;  %v1413_v32 = vmul.f32 %v2165_v13, %v1186_v28 }
 0x1a3   : > { %1512 = vst [vmem:[%s2173_s4 + $0xe8] sm:$0xff] %v1440_v30  ;;  %v1414_v33 = vmul.f32 %v2168_v16, %v1187_v31 }
 0x1a4   : > { %1485 = vst [vmem:[%s2173_s4 + $0x10] sm:$0xff] %v1413_v32 }
 0x1a5   : > { %1486 = vst [vmem:[%s2173_s4 + $0x18] sm:$0xff] %v1414_v33  ;;  %v1032_v35 = vpop.f32.mrf.mxu2 }
 0x1a6   : > { %v1214_v36 = vadd.f32 %v1032_v35, %v2160_v9  ;;  %v1131_v37 = vpop.f32.mrf.mxu3 }
 0x1a7   : > { %v1215_v39 = vadd.f32 %v1131_v37, %v2163_v11  ;;  %v1000_v21 = vpop.f32.mrf.mxu0 }
 0x1a8   : > { %v1441_v24 = vmul.f32 %v2165_v13, %v1214_v36  ;;  %v1188_v40 = vadd.f32 %v1000_v21, %v2160_v9  ;;  %v1099_v53 = vpop.f32.mrf.mxu1 }
 0x1a9   : > { %v1442_v45 = vmul.f32 %v2168_v16, %v1215_v39  ;;  %v1189_v46 = vadd.f32 %v1099_v53, %v2163_v11 }
 0x1aa   : > { %1513 = vst [vmem:[%s2173_s4 + $0xf0] sm:$0xff] %v1441_v24  ;;  %v1415_v41 = vmul.f32 %v2165_v13, %v1188_v40  ;;  %1819 = vmatmul.msk.bf16.gmra.mxu2 %vm931_vm4, %v1866_v38 }
 0x1ab   : > { %1514 = vst [vmem:[%s2173_s4 + $0xf8] sm:$0xff] %v1442_v45  ;;  %v1416_v42 = vmul.f32 %v2168_v16, %v1189_v46  ;;  %1837 = vmatmul.msk.bf16.gmra.mxu3 %vm931_vm4, %v1866_v38 }
 0x1ac   : > { %1487 = vst [vmem:[%s2173_s4 + $0x20] sm:$0xff] %v1415_v41 }
 0x1ad   : > { %1488 = vst [vmem:[%s2173_s4 + $0x28] sm:$0xff] %v1416_v42  ;;  %v1035_v43 = vpop.f32.mrf.mxu2 }
 0x1ae   : > { %v1216_v49 = vadd.f32 %v1035_v43, %v2160_v9  ;;  %v1134_v44 = vpop.f32.mrf.mxu3 }
 0x1af   : > { %v1217_v50 = vadd.f32 %v1134_v44, %v2163_v11  ;;  %v1002_v47 = vpop.f32.mrf.mxu0 }
 0x1b0   : > { %v1443_v54 = vmul.f32 %v2165_v13, %v1216_v49  ;;  %v1190_v48 = vadd.f32 %v1002_v47, %v2160_v9  ;;  %v1101_v51 = vpop.f32.mrf.mxu1 }
 0x1b1   : > { %v1444_v55 = vmul.f32 %v2168_v16, %v1217_v50  ;;  %v1191_v52 = vadd.f32 %v1101_v51, %v2163_v11 }
 0x1b2   : > { %1515 = vst [vmem:[%s2173_s4 + $0x100] sm:$0xff] %v1443_v54  ;;  %v1417_v56 = vmul.f32 %v2165_v13, %v1190_v48 }
 0x1b3   : > { %1516 = vst [vmem:[%s2173_s4 + $0x108] sm:$0xff] %v1444_v55  ;;  %v1418_v59 = vmul.f32 %v2168_v16, %v1191_v52 }
 0x1b4   : > { %1489 = vst [vmem:[%s2173_s4 + $0x30] sm:$0xff] %v1417_v56 }
 0x1b5   : > { %1490 = vst [vmem:[%s2173_s4 + $0x38] sm:$0xff] %v1418_v59  ;;  %v1037_v60 = vpop.f32.mrf.mxu2 }
 0x1b6   : > { %v1218_v57 = vadd.f32 %v1037_v60, %v2160_v9  ;;  %v1136_v61 = vpop.f32.mrf.mxu3 }
 0x1b7   : > { %v1219_v58 = vadd.f32 %v1136_v61, %v2163_v11  ;;  %v1005_v62 = vpop.f32.mrf.mxu0 }
 0x1b8   : > { %v1445_v63 = vmul.f32 %v2165_v13, %v1218_v57  ;;  %v1192_v0 = vadd.f32 %v1005_v62, %v2160_v9  ;;  %v1104_v1 = vpop.f32.mrf.mxu1 }
 0x1b9   : > { %v1446_v2 = vmul.f32 %v2168_v16, %v1219_v58  ;;  %v1193_v3 = vadd.f32 %v1104_v1, %v2163_v11 }
 0x1ba   : > { %1517 = vst [vmem:[%s2173_s4 + $0x110] sm:$0xff] %v1445_v63  ;;  %v1419_v4 = vmul.f32 %v2165_v13, %v1192_v0  ;;  %1820 = vmatmul.msk.bf16.gmra.mxu2 %vm931_vm4, %v1867_v34 }
 0x1bb   : > { %1518 = vst [vmem:[%s2173_s4 + $0x118] sm:$0xff] %v1446_v2  ;;  %v1420_v5 = vmul.f32 %v2168_v16, %v1193_v3  ;;  %1838 = vmatmul.msk.bf16.gmra.mxu3 %vm931_vm4, %v1867_v34 }
 0x1bc   : > { %1491 = vst [vmem:[%s2173_s4 + $0x40] sm:$0xff] %v1419_v4 }
 0x1bd   : > { %1492 = vst [vmem:[%s2173_s4 + $0x48] sm:$0xff] %v1420_v5  ;;  %v1040_v6 = vpop.f32.mrf.mxu2 }
 0x1be   : > { %v1220_v7 = vadd.f32 %v1040_v6, %v2160_v9  ;;  %v1139_v8 = vpop.f32.mrf.mxu3 }
 0x1bf   : > { %v1221_v10 = vadd.f32 %v1139_v8, %v2163_v11  ;;  %v1007_v12 = vpop.f32.mrf.mxu0 }
 0x1c0   : > { %v1447_v14 = vmul.f32 %v2165_v13, %v1220_v7  ;;  %v1194_v15 = vadd.f32 %v1007_v12, %v2160_v9  ;;  %v1106_v17 = vpop.f32.mrf.mxu1 }
 0x1c1   : > { %v1448_v18 = vmul.f32 %v2168_v16, %v1221_v10  ;;  %v1195_v19 = vadd.f32 %v1106_v17, %v2163_v11 }
 0x1c2   : > { %1519 = vst [vmem:[%s2173_s4 + $0x120] sm:$0xff] %v1447_v14  ;;  %v1421_v20 = vmul.f32 %v2165_v13, %v1194_v15 }
 0x1c3   : > { %1520 = vst [vmem:[%s2173_s4 + $0x128] sm:$0xff] %v1448_v18  ;;  %v1422_v22 = vmul.f32 %v2168_v16, %v1195_v19 }
 0x1c4   : > { %1493 = vst [vmem:[%s2173_s4 + $0x50] sm:$0xff] %v1421_v20 }
 0x1c5   : > { %1494 = vst [vmem:[%s2173_s4 + $0x58] sm:$0xff] %v1422_v22  ;;  %v1042_v23 = vpop.f32.mrf.mxu2 }
 0x1c6   : > { %v1222_v25 = vadd.f32 %v1042_v23, %v2160_v9  ;;  %v1141_v26 = vpop.f32.mrf.mxu3 }
 0x1c7   : > { %v1223_v27 = vadd.f32 %v1141_v26, %v2163_v11  ;;  %v1010_v28 = vpop.f32.mrf.mxu0 }
 0x1c8   : > { %v1449_v29 = vmul.f32 %v2165_v13, %v1222_v25  ;;  %v1196_v30 = vadd.f32 %v1010_v28, %v2160_v9  ;;  %v1109_v31 = vpop.f32.mrf.mxu1 }
 0x1c9   : > { %v1450_v32 = vmul.f32 %v2168_v16, %v1223_v27  ;;  %v1197_v33 = vadd.f32 %v1109_v31, %v2163_v11 }
 0x1ca   : > { %1521 = vst [vmem:[%s2173_s4 + $0x130] sm:$0xff] %v1449_v29  ;;  %v1423_v35 = vmul.f32 %v2165_v13, %v1196_v30 }
 0x1cb   : > { %1522 = vst [vmem:[%s2173_s4 + $0x138] sm:$0xff] %v1450_v32  ;;  %v1424_v36 = vmul.f32 %v2168_v16, %v1197_v33 }
 0x1cc   : > { %1495 = vst [vmem:[%s2173_s4 + $0x60] sm:$0xff] %v1423_v35 }
 0x1cd   : > { %1496 = vst [vmem:[%s2173_s4 + $0x68] sm:$0xff] %v1424_v36  ;;  %v1045_v37 = vpop.f32.mrf.mxu2 }
 0x1ce   : > { %v1224_v38 = vadd.f32 %v1045_v37, %v2160_v9  ;;  %v1144_v39 = vpop.f32.mrf.mxu3 }
 0x1cf   : > { %v1225_v21 = vadd.f32 %v1144_v39, %v2163_v11  ;;  %v1012_v24 = vpop.f32.mrf.mxu0 }
 0x1d0   : > { %v1451_v40 = vmul.f32 %v2165_v13, %v1224_v38  ;;  %v1198_v53 = vadd.f32 %v1012_v24, %v2160_v9  ;;  %v1111_v45 = vpop.f32.mrf.mxu1 }
 0x1d1   : > { %v1452_v46 = vmul.f32 %v2168_v16, %v1225_v21  ;;  %v1199_v41 = vadd.f32 %v1111_v45, %v2163_v11 }
 0x1d2   : > { %1523 = vst [vmem:[%s2173_s4 + $0x140] sm:$0xff] %v1451_v40  ;;  %v1425_v42 = vmul.f32 %v2165_v13, %v1198_v53 }
 0x1d3   : > { %1524 = vst [vmem:[%s2173_s4 + $0x148] sm:$0xff] %v1452_v46  ;;  %v1426_v43 = vmul.f32 %v2168_v16, %v1199_v41 }
 0x1d4   : > { %1497 = vst [vmem:[%s2173_s4 + $0x70] sm:$0xff] %v1425_v42 }
 0x1d5   : > { %1498 = vst [vmem:[%s2173_s4 + $0x78] sm:$0xff] %v1426_v43  ;;  %v1047_v49 = vpop.f32.mrf.mxu2 }
 0x1d6   : > { %v1226_v44 = vadd.f32 %v1047_v49, %v2160_v9  ;;  %v1146_v50 = vpop.f32.mrf.mxu3 }
 0x1d7   : > { %v1227_v47 = vadd.f32 %v1146_v50, %v2163_v11  ;;  %v1015_v54 = vpop.f32.mrf.mxu0 }
 0x1d8   : > { %v1453_v48 = vmul.f32 %v2165_v13, %v1226_v44  ;;  %v1200_v51 = vadd.f32 %v1015_v54, %v2160_v9  ;;  %v1114_v55 = vpop.f32.mrf.mxu1 }
 0x1d9   : > { %v1454_v52 = vmul.f32 %v2168_v16, %v1227_v47  ;;  %v1201_v56 = vadd.f32 %v1114_v55, %v2163_v11 }
 0x1da   : > { %1525 = vst [vmem:[%s2173_s4 + $0x150] sm:$0xff] %v1453_v48  ;;  %v1427_v59 = vmul.f32 %v2165_v13, %v1200_v51 }
 0x1db   : > { %1526 = vst [vmem:[%s2173_s4 + $0x158] sm:$0xff] %v1454_v52  ;;  %v1428_v60 = vmul.f32 %v2168_v16, %v1201_v56 }
 0x1dc   : > { %1499 = vst [vmem:[%s2173_s4 + $0x80] sm:$0xff] %v1427_v59 }
 0x1dd   : > { %1500 = vst [vmem:[%s2173_s4 + $0x88] sm:$0xff] %v1428_v60  ;;  %v1050_v57 = vpop.f32.mrf.mxu2 }
 0x1de   : > { %v1228_v61 = vadd.f32 %v1050_v57, %v2160_v9  ;;  %v1149_v34 = vpop.f32.mrf.mxu3 }
 0x1df   : > { %v1229_v58 = vadd.f32 %v1149_v34, %v2163_v11  ;;  %v1017_v62 = vpop.f32.mrf.mxu0 }
 0x1e0   : > { %v1455_v63 = vmul.f32 %v2165_v13, %v1228_v61  ;;  %v1202_v0 = vadd.f32 %v1017_v62, %v2160_v9  ;;  %v1116_v1 = vpop.f32.mrf.mxu1 }
 0x1e1   : > { %v1456_v2 = vmul.f32 %v2168_v16, %v1229_v58  ;;  %v1203_v3 = vadd.f32 %v1116_v1, %v2163_v11 }
 0x1e2   : > { %1527 = vst [vmem:[%s2173_s4 + $0x160] sm:$0xff] %v1455_v63  ;;  %v1429_v4 = vmul.f32 %v2165_v13, %v1202_v0 }
 0x1e3   : > { %1528 = vst [vmem:[%s2173_s4 + $0x168] sm:$0xff] %v1456_v2  ;;  %v1430_v5 = vmul.f32 %v2168_v16, %v1203_v3 }
 0x1e4   : > { %1501 = vst [vmem:[%s2173_s4 + $0x90] sm:$0xff] %v1429_v4 }
 0x1e5   : > { %1502 = vst [vmem:[%s2173_s4 + $0x98] sm:$0xff] %v1430_v5  ;;  %v1052_v6 = vpop.f32.mrf.mxu2 }
 0x1e6   : > { %v1230_v7 = vadd.f32 %v1052_v6, %v2160_v9  ;;  %v1151_v8 = vpop.f32.mrf.mxu3 }
 0x1e7   : > { %v1231_v10 = vadd.f32 %v1151_v8, %v2163_v11  ;;  %v1020_v12 = vpop.f32.mrf.mxu0 }
 0x1e8   : > { %v1457_v14 = vmul.f32 %v2165_v13, %v1230_v7  ;;  %v1204_v15 = vadd.f32 %v1020_v12, %v2160_v9  ;;  %v1119_v17 = vpop.f32.mrf.mxu1 }
 0x1e9   : > { %v1458_v18 = vmul.f32 %v2168_v16, %v1231_v10  ;;  %v1205_v19 = vadd.f32 %v1119_v17, %v2163_v11 }
 0x1ea   : > { %1529 = vst [vmem:[%s2173_s4 + $0x170] sm:$0xff] %v1457_v14  ;;  %v1431_v20 = vmul.f32 %v2165_v13, %v1204_v15 }
 0x1eb   : > { %1530 = vst [vmem:[%s2173_s4 + $0x178] sm:$0xff] %v1458_v18  ;;  %v1432_v22 = vmul.f32 %v2168_v16, %v1205_v19 }
 0x1ec   : > { %1503 = vst [vmem:[%s2173_s4 + $0xa0] sm:$0xff] %v1431_v20 }
 0x1ed   : > { %1504 = vst [vmem:[%s2173_s4 + $0xa8] sm:$0xff] %v1432_v22  ;;  %v1055_v23 = vpop.f32.mrf.mxu2 }
 0x1ee   : > { %v1232_v25 = vadd.f32 %v1055_v23, %v2160_v9  ;;  %v1154_v26 = vpop.f32.mrf.mxu3 }
 0x1ef   : > { %v1233_v27 = vadd.f32 %v1154_v26, %v2163_v11  ;;  %v1022_v28 = vpop.f32.mrf.mxu0 }
 0x1f0   : > { %v1459_v29 = vmul.f32 %v2165_v13, %v1232_v25  ;;  %v1206_v30 = vadd.f32 %v1022_v28, %v2160_v9  ;;  %v1121_v31 = vpop.f32.mrf.mxu1 }
 0x1f1   : > { %v1460_v32 = vmul.f32 %v2168_v16, %v1233_v27  ;;  %v1207_v33 = vadd.f32 %v1121_v31, %v2163_v11 }
 0x1f2   : > { %1531 = vst [vmem:[%s2173_s4 + $0x180] sm:$0xff] %v1459_v29  ;;  %v1433_v35 = vmul.f32 %v2165_v13, %v1206_v30 }
 0x1f3   : > { %1532 = vst [vmem:[%s2173_s4 + $0x188] sm:$0xff] %v1460_v32  ;;  %v1434_v36 = vmul.f32 %v2168_v16, %v1207_v33 }
 0x1f4   : > { %1505 = vst [vmem:[%s2173_s4 + $0xb0] sm:$0xff] %v1433_v35 }
 0x1f5   : > { %1506 = vst [vmem:[%s2173_s4 + $0xb8] sm:$0xff] %v1434_v36  ;;  %v1057_v37 = vpop.f32.mrf.mxu2 }
 0x1f6   : > { %v1234_v38 = vadd.f32 %v1057_v37, %v2160_v9  ;;  %v1156_v39 = vpop.f32.mrf.mxu3 }
 0x1f7   : > { %v1235_v21 = vadd.f32 %v1156_v39, %v2163_v11  ;;  %v1025_v24 = vpop.f32.mrf.mxu0 }
 0x1f8   : > { %v1461_v40 = vmul.f32 %v2165_v13, %v1234_v38  ;;  %v1208_v53 = vadd.f32 %v1025_v24, %v2160_v9  ;;  %v1124_v45 = vpop.f32.mrf.mxu1 }
 0x1f9   : > { %v1462_v46 = vmul.f32 %v2168_v16, %v1235_v21  ;;  %v1209_v41 = vadd.f32 %v1124_v45, %v2163_v11 }
 0x1fa   : > { %1533 = vst [vmem:[%s2173_s4 + $0x190] sm:$0xff] %v1461_v40  ;;  %v1435_v42 = vmul.f32 %v2165_v13, %v1208_v53 }
 0x1fb   : > { %1534 = vst [vmem:[%s2173_s4 + $0x198] sm:$0xff] %v1462_v46  ;;  %v1436_v43 = vmul.f32 %v2168_v16, %v1209_v41 }
 0x1fc   : > { %1507 = vst [vmem:[%s2173_s4 + $0xc0] sm:$0xff] %v1435_v42 }
 0x1fd   : > { %1508 = vst [vmem:[%s2173_s4 + $0xc8] sm:$0xff] %v1436_v43  ;;  %v1060_v49 = vpop.f32.mrf.mxu2 }
 0x1fe   : > { %v1236_v44 = vadd.f32 %v1060_v49, %v2160_v9  ;;  %v1159_v50 = vpop.f32.mrf.mxu3 }
 0x1ff   : > { %v1237_v47 = vadd.f32 %v1159_v50, %v2163_v11  ;;  %v1027_v54 = vpop.f32.mrf.mxu0 }
 0x200   : > { %v1463_v48 = vmul.f32 %v2165_v13, %v1236_v44  ;;  %v1210_v51 = vadd.f32 %v1027_v54, %v2160_v9  ;;  %v1126_v55 = vpop.f32.mrf.mxu1 }
 0x201   : > { %v1464_v52 = vmul.f32 %v2168_v16, %v1237_v47  ;;  %v1211_v56 = vadd.f32 %v1126_v55, %v2163_v11 }
 0x202   : > { %1535 = vst [vmem:[%s2173_s4 + $0x1a0] sm:$0xff] %v1463_v48  ;;  %v1437_v59 = vmul.f32 %v2165_v13, %v1210_v51 }
 0x203   : > { %1536 = vst [vmem:[%s2173_s4 + $0x1a8] sm:$0xff] %v1464_v52  ;;  %v1438_v60 = vmul.f32 %v2168_v16, %v1211_v56 }
 0x204   : > { %1509 = vst [vmem:[%s2173_s4 + $0xd0] sm:$0xff] %v1437_v59 }
 0x205   : > { %1510 = vst [vmem:[%s2173_s4 + $0xd8] sm:$0xff] %v1438_v60  ;;  %v1062_v57 = vpop.f32.mrf.mxu2 }
 0x206   : > { %v1238_v61 = vadd.f32 %v1062_v57, %v2160_v9  ;;  %v1161_v34 = vpop.f32.mrf.mxu3 }
 0x207   : > { %v1239_v58 = vadd.f32 %v1161_v34, %v2163_v11 }
 0x208   : > { %v1465_v62 = vmul.f32 %v2165_v13, %v1238_v61 }
 0x209   : > { %v1466_v63 = vmul.f32 %v2168_v16, %v1239_v58 }
 0x20a   : > { %1537 = vst [vmem:[%s2173_s4 + $0x1b0] sm:$0xff] %v1465_v62 }
 0x20b   : > { %1538 = vst [vmem:[%s2173_s4 + $0x1b8] sm:$0xff] %v1466_v63 }
 0x20d   : > { %v1065_v0 = vpop.f32.mrf.mxu2 }
 0x20e   : > { %v1240_v1 = vadd.f32 %v1065_v0, %v2160_v9  ;;  %v1164_v2 = vpop.f32.mrf.mxu3 }
 0x20f   : > { %v1241_v3 = vadd.f32 %v1164_v2, %v2163_v11 }
 0x210   : > { %v1467_v4 = vmul.f32 %v2165_v13, %v1240_v1 }
 0x211   : > { %v1468_v5 = vmul.f32 %v2168_v16, %v1241_v3 }
 0x212   : > { %1539 = vst [vmem:[%s2173_s4 + $0x1c0] sm:$0xff] %v1467_v4 }
 0x213   : > { %1540 = vst [vmem:[%s2173_s4 + $0x1c8] sm:$0xff] %v1468_v5 }
 0x215   : > { %v1067_v6 = vpop.f32.mrf.mxu2 }
 0x216   : > { %v1242_v7 = vadd.f32 %v1067_v6, %v2160_v9  ;;  %v1166_v8 = vpop.f32.mrf.mxu3 }
 0x217   : > { %v1243_v10 = vadd.f32 %v1166_v8, %v2163_v11 }
 0x218   : > { %v1469_v12 = vmul.f32 %v2165_v13, %v1242_v7 }
 0x219   : > { %v1470_v14 = vmul.f32 %v2168_v16, %v1243_v10 }
 0x21a   : > { %1541 = vst [vmem:[%s2173_s4 + $0x1d0] sm:$0xff] %v1469_v12 }
 0x21b   : > { %1542 = vst [vmem:[%s2173_s4 + $0x1d8] sm:$0xff] %v1470_v14 }
 0x21d   : > { %v1070_v15 = vpop.f32.mrf.mxu2 }
 0x21e   : > { %v1244_v17 = vadd.f32 %v1070_v15, %v2160_v9  ;;  %v1169_v18 = vpop.f32.mrf.mxu3 }
 0x21f   : > { %v1245_v19 = vadd.f32 %v1169_v18, %v2163_v11 }
 0x220   : > { %v1471_v20 = vmul.f32 %v2165_v13, %v1244_v17 }
 0x221   : > { %v1472_v22 = vmul.f32 %v2168_v16, %v1245_v19 }
 0x222   : > { %1543 = vst [vmem:[%s2173_s4 + $0x1e0] sm:$0xff] %v1471_v20 }
 0x223   : > { %1544 = vst [vmem:[%s2173_s4 + $0x1e8] sm:$0xff] %v1472_v22 }
 0x225   : > { %v1072_v23 = vpop.f32.mrf.mxu2 }
 0x226   : > { %v1246_v25 = vadd.f32 %v1072_v23, %v2160_v9  ;;  %v1171_v26 = vpop.f32.mrf.mxu3 }
 0x227   : > { %v1247_v27 = vadd.f32 %v1171_v26, %v2163_v11 }
 0x228   : > { %v1473_v28 = vmul.f32 %v2165_v13, %v1246_v25 }
 0x229   : > { %v1474_v29 = vmul.f32 %v2168_v16, %v1247_v27 }
 0x22a   : > { %1545 = vst [vmem:[%s2173_s4 + $0x1f0] sm:$0xff] %v1473_v28 }
 0x22b   : > { %1546 = vst [vmem:[%s2173_s4 + $0x1f8] sm:$0xff] %v1474_v29 }
 0x22d   : > { %v1075_v30 = vpop.f32.mrf.mxu2 }
 0x22e   : > { %v1248_v31 = vadd.f32 %v1075_v30, %v2160_v9  ;;  %v1174_v32 = vpop.f32.mrf.mxu3 }
 0x22f   : > { %v1249_v33 = vadd.f32 %v1174_v32, %v2163_v11 }
 0x230   : > { %v1475_v35 = vmul.f32 %v2165_v13, %v1248_v31 }
 0x231   : > { %v1476_v36 = vmul.f32 %v2168_v16, %v1249_v33 }
 0x232   : > { %1547 = vst [vmem:[%s2173_s4 + $0x200] sm:$0xff] %v1475_v35 }
 0x233   : > { %1548 = vst [vmem:[%s2173_s4 + $0x208] sm:$0xff] %v1476_v36 }
 0x235   : > { %v1077_v37 = vpop.f32.mrf.mxu2 }
 0x236   : > { %v1250_v38 = vadd.f32 %v1077_v37, %v2160_v9  ;;  %v1176_v39 = vpop.f32.mrf.mxu3 }
 0x237   : > { %v1251_v21 = vadd.f32 %v1176_v39, %v2163_v11 }
 0x238   : > { %v1477_v24 = vmul.f32 %v2165_v13, %v1250_v38 }
 0x239   : > { %v1478_v40 = vmul.f32 %v2168_v16, %v1251_v21 }
 0x23a   : > { %1549 = vst [vmem:[%s2173_s4 + $0x210] sm:$0xff] %v1477_v24 }
 0x23b   : > { %1550 = vst [vmem:[%s2173_s4 + $0x218] sm:$0xff] %v1478_v40 }
 0x23d   : > { %v1080_v53 = vpop.f32.mrf.mxu2 }
 0x23e   : > { %v1252_v45 = vadd.f32 %v1080_v53, %v2160_v9  ;;  %v1179_v46 = vpop.f32.mrf.mxu3 }
 0x23f   : > { %v1253_v41 = vadd.f32 %v1179_v46, %v2163_v11 }
 0x240   : > { %v1479_v42 = vmul.f32 %v2165_v13, %v1252_v45 }
 0x241   : > { %v1480_v43 = vmul.f32 %v2168_v16, %v1253_v41 }
 0x242   : > { %1551 = vst [vmem:[%s2173_s4 + $0x220] sm:$0xff] %v1479_v42 }
 0x243   : > { %1552 = vst [vmem:[%s2173_s4 + $0x228] sm:$0xff] %v1480_v43 }
 0x245   : > { %v1082_v49 = vpop.f32.mrf.mxu2 }
 0x246   : > { %v1254_v44 = vadd.f32 %v1082_v49, %v2160_v9  ;;  %v1181_v50 = vpop.f32.mrf.mxu3 }
 0x247   : > { %v1255_v47 = vadd.f32 %v1181_v50, %v2163_v11 }
 0x248   : > { %v1481_v54 = vmul.f32 %v2165_v13, %v1254_v44 }
 0x249   : > { %v1482_v48 = vmul.f32 %v2168_v16, %v1255_v47 }
 0x24a   : > { %1553 = vst [vmem:[%s2173_s4 + $0x230] sm:$0xff] %v1481_v54 }
 0x24b   : > { %1554 = vst [vmem:[%s2173_s4 + $0x238] sm:$0xff] %v1482_v48 }
 0x24c PF: > { %s13_s14 = sadd.s32 1, %s1963_s14   ;;  %s2413_s12 = smov %s1959_s13 }
 0x24d   : > { %p10_p5 = scmp.ge.s32.totalorder %s13_s14, 4   ;;  %s2414_s13 = smov %s2416_s15 }
 0x24f   :  { %12 = sbr.rel (!%p10_p5) target bundleno = 2 (0x2), region = 76 }

// kernel: cross_scale_attention_forward.7
= control target key start
LH: loop header
LB: loop body
LE: loop exit
PB: predicated region body
PF: predicated region fallthrough
CT: control target
= control target key end

     0   :  { %s497_s15 = smov 0   ;;  %s499_s16 = smov 0   ;;  %s563_s0 = inlined_call_operand.vmem [shape: f32[2,72,256], index: 0, kind: input, shape index: {}]   ;;  %s564_s1 = inlined_call_operand.vmem [shape: f32[8,72], index: 1, kind: input, shape index: {}]   ;;  %s565_s2 = inlined_call_operand.vmem [shape: f32[8,1], index: 2, kind: input, shape index: {}]   ;;  %s566_s3 = inlined_call_operand.vmem [shape: f32[8,1], index: 3, kind: input, shape index: {}]   ;;  %s567_s4 = inlined_call_operand.vmem [shape: f32[2,8,256], index: 4, kind: output, shape index: {}]  }
   0x1   :  { %s501_s17 = smov 0  }
   0x2 LB: > { %s26_s18 = sadd.s32 1, %s465_s16  ;;  %p411_p0 = scmp.ge.s32.totalorder %s469_s17, 1  ;;  %s469_s17 = sphi %s501_s17, %s14_s17   ;;  %s465_s16 = sphi %s499_s16, %s569_s16   ;;  %s461_s15 = sphi %s497_s15, %s568_s15  }
   0x3   : > { %p28_p1 = scmp.ge.s32.totalorder %s26_s18, 2  ;;  %p183_p2 = scmp.lt.s32.totalorder %s469_s17, 3 }
   0x5   : > { %s571_s18 = smov (%p28_p1, %s26_s18), 0  ;;  %p184_p3 = pnand %p411_p0, %p183_p2 }
   0x6   : > { %p218_p4 = scmp.lt.s32.totalorder (!%p184_p3), %s461_s15, 1 }
   0x7   : > { %187 = sbr.rel (%p184_p3) target bundleno = 167 (0xa7), region = 36 }
   0xc   : > { %v256_v0 = vld [vmem:[%s565_s2] sm:$0xff]  ;;  %v471_v1 = vmov 0   ;;  %s573_s15 = smov (!%p218_p4, %s461_s15), 1  ;;  %vm262_vm0 = vcmask 588800  }
   0xd   : > { %446 = vset.pattern.permute.xlu0 %v471_v1  ;;  %s420_s21 = smul.u32 144, %s573_s15  ;;  %v306_v6 = vld [vmem:[%s566_s3] sm:$0xff]  ;;  %s419_s29 = sshll.u32 %s573_s15, 4 }
   0xe   : > { %259 = vperm.xlu0 %446, %v256_v0   ;;  %v237_v21 = vld [vmem:[%s564_s1] sm:$0xff]  ;;  %s235_s6 = scalar_lea.vmem %s567_s4, %s419_s29 }
   0xf   : > { %s524_s24 = scalar_lea.vmem %s563_s0, %s420_s21 }
  0x10   : > { %v254_v2 = vld [vmem:[%s524_s24 + $0x80] sm:$0xff]  ;;  %v255_v3 = vld [vmem:[%s524_s24 + $0x88] sm:$0xff]  ;;  %v252_v4 = vld [vmem:[%s524_s24 + $0x70] sm:$0xff] }
  0x11   : > { %273 = vmatpush.msra.mxu0 %v254_v2  ;;  %293 = vmatpush.msra.mxu1 %v255_v3  ;;  %v253_v5 = vld [vmem:[%s524_s24 + $0x78] sm:$0xff]  ;;  %v250_v7 = vld [vmem:[%s524_s24 + $0x60] sm:$0xff]  ;;  %v251_v8 = vld [vmem:[%s524_s24 + $0x68] sm:$0xff] }
  0x12   : > { %v248_v9 = vld [vmem:[%s524_s24 + $0x50] sm:$0xff]  ;;  %v249_v10 = vld [vmem:[%s524_s24 + $0x58] sm:$0xff]  ;;  %v246_v11 = vld [vmem:[%s524_s24 + $0x40] sm:$0xff] }
  0x13   : > { %274 = vmatpush.msra.mxu0 %v252_v4  ;;  %294 = vmatpush.msra.mxu1 %v253_v5  ;;  %v247_v12 = vld [vmem:[%s524_s24 + $0x48] sm:$0xff]  ;;  %v244_v13 = vld [vmem:[%s524_s24 + $0x30] sm:$0xff]  ;;  %v245_v14 = vld [vmem:[%s524_s24 + $0x38] sm:$0xff] }
  0x14   : > { %v242_v15 = vld [vmem:[%s524_s24 + $0x20] sm:$0xff]  ;;  %v243_v16 = vld [vmem:[%s524_s24 + $0x28] sm:$0xff]  ;;  %v240_v17 = vld [vmem:[%s524_s24 + $0x10] sm:$0xff] }
  0x15   : > { %275 = vmatpush.msra.mxu0 %v250_v7  ;;  %295 = vmatpush.msra.mxu1 %v251_v8  ;;  %v241_v18 = vld [vmem:[%s524_s24 + $0x18] sm:$0xff]  ;;  %v238_v19 = vld [vmem:[%s524_s24] sm:$0xff]  ;;  %v239_v20 = vld [vmem:[%s524_s24 + $0x8] sm:$0xff] }
  0x16   : > { %311 = vperm.xlu0 %446, %v306_v6  }
  0x17   : > { %276 = vmatpush.msra.mxu0 %v248_v9  ;;  %296 = vmatpush.msra.mxu1 %v249_v10 }
  0x19   : > { %277 = vmatpush.msra.mxu0 %v246_v11  ;;  %297 = vmatpush.msra.mxu1 %v247_v12 }
  0x1b   : > { %278 = vmatpush.msra.mxu0 %v244_v13  ;;  %298 = vmatpush.msra.mxu1 %v245_v14 }
  0x1d   : > { %279 = vmatpush.msra.mxu0 %v242_v15  ;;  %299 = vmatpush.msra.mxu1 %v243_v16 }
  0x1f   : > { %280 = vmatpush.msra.mxu0 %v240_v17  ;;  %300 = vmatpush.msra.mxu1 %v241_v18 }
  0x21   : > { %281 = vmatpush.msra.mxu0 %v238_v19  ;;  %301 = vmatpush.msra.mxu1 %v239_v20 }
  0x22   : > { %415 = vmatmul.msk.f32.vlgmr.msra.gmra.mxu0 %vm262_vm0, %v237_v21  ;;  %416 = vmatmul.msk.f32.vlgmr.msra.gmra.mxu1 %vm262_vm0, %v237_v21 }
  0x80   : > { %v260_v22 = vpop.permute.xlu0 %259 }
  0x88   : > { %v312_v27 = vpop.permute.xlu0 %311 }
  0x9f   : > { %v283_v23 = vpop.f32.mrf.mxu0  ;;  %v303_v24 = vpop.f32.mrf.mxu1 }
  0xa0   : > { %v284_v25 = vadd.f32 %v283_v23, %v260_v22  ;;  %v304_v26 = vadd.f32 %v303_v24, %v260_v22 }
  0xa2   : > { %vm307_vm1 = vcmp.ge.f32.partialorder %v284_v25, 0.0  ;;  %v314_v28 = vmul.f32 %v312_v27, %v284_v25  ;;  %vm308_vm2 = vcmp.ge.f32.partialorder %v304_v26, 0.0  ;;  %v315_v29 = vmul.f32 %v312_v27, %v304_v26 }
  0xa4   : > { %v316_v30 = vsel %vm307_vm1, %v284_v25, %v314_v28  ;;  %v317_v31 = vsel %vm308_vm2, %v304_v26, %v315_v29 }
  0xa5   : > { %318 = vst [vmem:[%s235_s6] sm:$0xff] %v316_v30 }
  0xa6   : > { %319 = vst [vmem:[%s235_s6 + $0x8] sm:$0xff] %v317_v31 }
  0xa7 PF: > { %s14_s17 = sadd.s32 1, %s469_s17   ;;  %s568_s15 = smov %s465_s16 }
  0xa8   : > { %p11_p5 = scmp.ge.s32.totalorder %s14_s17, 4   ;;  %s569_s16 = smov %s571_s18 }
  0xaa   :  { %13 = sbr.rel (!%p11_p5) target bundleno = 2 (0x2), region = 66 }

</bundles_post_ra>
